<compile_context>
chip_gen: v7x
topology: tpu7x:2x2x1
jax: 0.10.0
libtpu: 0.0.40
codegen_flags: <defaults>
</compile_context>

<pallas_src>
import numpy as np
import jax
import jax.numpy as jnp
from jax.experimental import pallas as pl
from jax.experimental.pallas import tpu as pltpu

# Network dimensions implied by the module (fc1 input = 18 * 16 * 16).
B, CIN, H, W = 2, 3, 32, 32
COUT = 18
KH = KW = 3
KKC = KH * KW * CIN            # 27 im2col rows per conv output position
HO, WO = H // 2, W // 2        # 16, 16 (after 2x2 max-pool)
S = HO * WO                    # 256 pooled positions per image
FLAT = COUT * S                # 4608 = fc1 fan-in
HID = 64
HIDP = 128                     # fc1 width zero-padded to a full 128-lane tile
NCLS = 10

# Batch blocking: two grid steps whenever B >= 2 (one per v7x TensorCore),
# IMG = B // NSTEP images per step (amortizes per-step overhead for larger B).
NSTEP = 2 if B >= 2 else 1
assert B % NSTEP == 0
IMG = B // NSTEP
P = IMG * S                    # pooled positions per grid step
NPOS = 4 * P                   # conv positions per grid step (pool-grouped)


def simple_cnn_kernel(patches_ref, cw_ref, cb_ref, w1_ref, b1_ref,
                      w2_ref, b2_ref, o_ref):
    """IMG images per grid step.

    patches_ref: (1, KKC, NPOS) bf16  im2col patches; column n = p*P + i*S + s
                                      (p = 2x2 pool position, i = image in
                                       step, s = ho*WO + wo)
    cw_ref     : (COUT, KKC)    bf16  conv weight
    cb_ref     : (COUT, 1)      f32   conv bias
    w1_ref     : (FLAT, HIDP)   bf16  fc1 weight, row c*S+s, cols >= HID zero
    b1_ref     : (1, HIDP)      f32   cols >= HID zero
    w2_ref     : (HIDP, NCLS)   bf16  fc2 weight, rows >= HID zero
    b2_ref     : (1, NCLS)      f32
    o_ref      : (1, IMG, NCLS) f32
    """
    patches = patches_ref[0]                                   # (KKC, NPOS)

    # --- conv 3x3 (pad=1) for all IMG images: one bf16 MXU matmul, f32 acc.
    conv = jnp.dot(cw_ref[...], patches, preferred_element_type=jnp.float32)
    conv = jnp.maximum(conv + cb_ref[...], 0.0)                # bias + ReLU

    # --- 2x2 max-pool: pool positions are 4 contiguous lane blocks of width P.
    pooled = jnp.maximum(
        jnp.maximum(conv[:, 0 * P:1 * P], conv[:, 1 * P:2 * P]),
        jnp.maximum(conv[:, 2 * P:3 * P], conv[:, 3 * P:4 * P]))  # (COUT, P)

    # --- flatten to lane-dense (IMG, FLAT) rows in NCHW order (c*S + s) by
    # concatenating channel rows along the lane axis (no risky reshape).
    rows = []
    for i in range(IMG):                                       # static unroll
        rows.append(jnp.concatenate(
            [pooled[c:c + 1, i * S:(i + 1) * S] for c in range(COUT)], axis=1))
    flat = rows[0] if IMG == 1 else jnp.concatenate(rows, axis=0)  # (IMG, FLAT)

    # --- fc1: single K=4608 MXU matmul (HID padded to 128 lanes), then ReLU.
    h = jnp.dot(flat.astype(jnp.bfloat16), w1_ref[...],
                preferred_element_type=jnp.float32) + b1_ref[...]
    h = jnp.maximum(h, 0.0)                                    # (IMG, HIDP)

    # --- fc2 (zero rows of the padded w2 cancel the padded hidden columns).
    out = jnp.dot(h.astype(jnp.bfloat16), w2_ref[...],
                  preferred_element_type=jnp.float32) + b2_ref[...]
    o_ref[0] = out


def _im2col_pool_grouped(x_nchw):
    """(B, CIN, H, W) f32 -> (NSTEP, KKC, NPOS) bf16 patch matrices.

    Per step, column n = (2*py + px)*P + i*S + ho*WO + wo (pool-position-major,
    then image-in-step, then spatial) and row r = (dy*KW + dx)*CIN + c, which
    matches the conv-weight layout built in the wrapper.
    """
    x = jnp.transpose(x_nchw, (0, 2, 3, 1))                    # (B, H, W, CIN)
    xp = jnp.pad(x, ((0, 0), (1, 1), (1, 1), (0, 0)))          # pad=1 for 3x3
    taps = [xp[:, dy:dy + H, dx:dx + W, :]
            for dy in range(KH) for dx in range(KW)]
    pat = jnp.stack(taps, axis=3)                              # (B, H, W, 9, CIN)
    pat = pat.reshape(NSTEP, IMG, HO, 2, WO, 2, KH * KW, CIN)  # h=2ho+py, w=2wo+px
    pat = jnp.transpose(pat, (0, 3, 5, 1, 2, 4, 6, 7))         # (step,py,px,i,ho,wo,kk,c)
    pat = pat.reshape(NSTEP, NPOS, KKC)
    return jnp.transpose(pat, (0, 2, 1)).astype(jnp.bfloat16)  # (NSTEP, KKC, NPOS)


def simple_cnn_forward(x_nchw, params):
    """x_nchw: (B, CIN, H, W) f32, PyTorch layout.  Returns (B, NCLS) f32."""
    conv_w, conv_b, fc1_w, fc1_b, fc2_w, fc2_b = params

    patches = _im2col_pool_grouped(x_nchw)                     # (NSTEP, 27, NPOS) bf16

    # conv weight (COUT, CIN, KH, KW) -> (COUT, 27) matching patch row order.
    cw = jnp.transpose(conv_w, (0, 2, 3, 1)).reshape(COUT, KKC).astype(jnp.bfloat16)
    cb = conv_b.reshape(COUT, 1)

    # fc1 weight (HID, FLAT) -> (FLAT, HIDP) bf16, zero-padded 64 -> 128 so the
    # MXU N tiles are unmasked; b1 padded the same way (padded hiddens stay 0).
    w1 = jnp.pad(jnp.transpose(fc1_w), ((0, 0), (0, HIDP - HID))).astype(jnp.bfloat16)
    b1 = jnp.pad(fc1_b, (0, HIDP - HID)).reshape(1, HIDP)

    # fc2 weight (NCLS, HID) -> (HIDP, NCLS) bf16 with zero rows >= HID.
    w2 = jnp.pad(jnp.transpose(fc2_w), ((0, HIDP - HID), (0, 0))).astype(jnp.bfloat16)
    b2 = fc2_b.reshape(1, NCLS)

    def const(*shape):
        # Constant-index blocks: DMA'd once and kept resident across steps.
        return pl.BlockSpec(shape, lambda i, _z=(0,) * len(shape): _z)

    out = pl.pallas_call(
        simple_cnn_kernel,
        out_shape=jax.ShapeDtypeStruct((NSTEP, IMG, NCLS), jnp.float32),
        grid_spec=pltpu.PrefetchScalarGridSpec(
            num_scalar_prefetch=0,
            grid=(NSTEP,),
            in_specs=[
                pl.BlockSpec((1, KKC, NPOS), lambda i: (i, 0, 0)),  # per-step patches
                const(COUT, KKC),        # conv weight   (resident, bf16)
                const(COUT, 1),          # conv bias     (resident)
                const(FLAT, HIDP),       # fc1 weight    (resident, bf16, padded)
                const(1, HIDP),          # fc1 bias      (resident, padded)
                const(HIDP, NCLS),       # fc2 weight    (resident, bf16, padded)
                const(1, NCLS),          # fc2 bias      (resident)
            ],
            out_specs=pl.BlockSpec((1, IMG, NCLS), lambda i: (i, 0, 0)),
        ),
        compiler_params=pltpu.CompilerParams(
            dimension_semantics=("parallel",)),  # v7x: split steps across TCs
    )(patches, cw, cb, w1, b1, w2, b2)
    return out.reshape(B, NCLS)


def reference_forward(x_nchw, params):
    """Plain-JAX reference with exact PyTorch (NCHW) semantics."""
    conv_w, conv_b, fc1_w, fc1_b, fc2_w, fc2_b = params
    hp = jax.lax.Precision.HIGHEST
    y = jax.lax.conv_general_dilated(
        x_nchw, conv_w, window_strides=(1, 1), padding=((1, 1), (1, 1)),
        dimension_numbers=("NCHW", "OIHW", "NCHW"), precision=hp)
    y = jax.nn.relu(y + conv_b[None, :, None, None])
    y = jax.lax.reduce_window(y, -jnp.inf, jax.lax.max,
                              (1, 1, 2, 2), (1, 1, 2, 2), "VALID")
    y = y.reshape(B, FLAT)                                     # NCHW flatten order
    y = jax.nn.relu(jnp.dot(y, fc1_w.T, precision=hp) + fc1_b)
    return jnp.dot(y, fc2_w.T, precision=hp) + fc2_b


def init_params(key):
    """Deterministic PyTorch-default-style init (uniform +-1/sqrt(fan_in))."""
    ks = jax.random.split(key, 6)

    def unif(k, shape, fan_in):
        bound = 1.0 / np.sqrt(fan_in)
        return jax.random.uniform(k, shape, jnp.float32, -bound, bound)

    conv_w = unif(ks[0], (COUT, CIN, KH, KW), CIN * KH * KW)
    conv_b = unif(ks[1], (COUT,), CIN * KH * KW)
    fc1_w = unif(ks[2], (HID, FLAT), FLAT)
    fc1_b = unif(ks[3], (HID,), FLAT)
    fc2_w = unif(ks[4], (NCLS, HID), HID)
    fc2_b = unif(ks[5], (NCLS,), HID)
    return (conv_w, conv_b, fc1_w, fc1_b, fc2_w, fc2_b)


if __name__ == "__main__":
    root = jax.random.PRNGKey(0)
    k_params, k_x = jax.random.split(root)
    params = init_params(k_params)
    x = jax.random.normal(k_x, (B, CIN, H, W), jnp.float32)

    out = jax.block_until_ready(jax.jit(simple_cnn_forward)(x, params))

    assert out.shape == (B, NCLS) and out.dtype == jnp.float32
    assert bool(jnp.all(jnp.isfinite(out)))

    ref = jax.block_until_ready(reference_forward(x, params))
    np.testing.assert_allclose(np.asarray(out), np.asarray(ref),
                               rtol=5e-2, atol=2.5e-2)

    print("KERNEL_OK")
</pallas_src>

<mosaic_0001>
module attributes {stable_mosaic.version = 11 : i64} {
  func.func @simple_cnn_kernel(%arg0: i32, %arg1: memref<1x27x1024xbf16, #tpu.memory_space<vmem>>, %arg2: memref<18x27xbf16, #tpu.memory_space<vmem>>, %arg3: memref<18x1xf32, #tpu.memory_space<vmem>>, %arg4: memref<4608x128xbf16, #tpu.memory_space<vmem>>, %arg5: memref<1x128xf32, #tpu.memory_space<vmem>>, %arg6: memref<128x10xbf16, #tpu.memory_space<vmem>>, %arg7: memref<1x10xf32, #tpu.memory_space<vmem>>, %arg8: memref<1x1x10xf32, #tpu.memory_space<vmem>>) attributes {dimension_semantics = [#tpu.dimension_semantics<parallel>], iteration_bounds = array<i64: 2>, scalar_prefetch = 0 : i64, scratch_operands = 0 : i64, tpu.core_type = #tpu.core_type<tc>, window_params = [{transform_indices = @transform_0, window_bounds = array<i64: 1, 27, 1024>}, {pipeline_mode = #tpu.pipeline_mode<synchronous>, transform_indices = @transform_1, window_bounds = array<i64: 18, 27>}, {pipeline_mode = #tpu.pipeline_mode<synchronous>, transform_indices = @transform_2, window_bounds = array<i64: 18, 1>}, {pipeline_mode = #tpu.pipeline_mode<synchronous>, transform_indices = @transform_3, window_bounds = array<i64: 4608, 128>}, {pipeline_mode = #tpu.pipeline_mode<synchronous>, transform_indices = @transform_4, window_bounds = array<i64: 1, 128>}, {pipeline_mode = #tpu.pipeline_mode<synchronous>, transform_indices = @transform_5, window_bounds = array<i64: 128, 10>}, {pipeline_mode = #tpu.pipeline_mode<synchronous>, transform_indices = @transform_6, window_bounds = array<i64: 1, 10>}, {transform_indices = @transform_7, window_bounds = array<i64: 1, 1, 10>}]} {
    %c0 = arith.constant 0 : index
    %c0_0 = arith.constant 0 : index
    %c0_1 = arith.constant 0 : index
    %0 = vector.load %arg1[%c0, %c0_0, %c0_1] : memref<1x27x1024xbf16, #tpu.memory_space<vmem>>, vector<1x27x1024xbf16>
    %1 = vector.shape_cast %0 : vector<1x27x1024xbf16> to vector<27x1024xbf16>
    %c0_2 = arith.constant 0 : index
    %c0_3 = arith.constant 0 : index
    %2 = vector.load %arg2[%c0_2, %c0_3] : memref<18x27xbf16, #tpu.memory_space<vmem>>, vector<18x27xbf16>
    %cst = arith.constant dense<0.000000e+00> : vector<18x1024xf32>
    %3 = tpu.matmul %2, %1, %cst {dimension_numbers = #tpu.dot_dimension_numbers<[1], [0], [0], [1], [0, 0, 1, 1], [], []>} : vector<18x27xbf16>, vector<27x1024xbf16>, vector<18x1024xf32> -> vector<18x1024xf32>
    %c0_4 = arith.constant 0 : index
    %c0_5 = arith.constant 0 : index
    %4 = vector.load %arg3[%c0_4, %c0_5] : memref<18x1xf32, #tpu.memory_space<vmem>>, vector<18x1xf32>
    %5 = vector.broadcast %4 : vector<18x1xf32> to vector<18x1024xf32>
    %6 = arith.addf %3, %5 : vector<18x1024xf32>
    %cst_6 = arith.constant 0.000000e+00 : f32
    %7 = vector.broadcast %cst_6 : f32 to vector<18x1024xf32>
    %8 = arith.maximumf %6, %7 : vector<18x1024xf32>
    %9 = vector.extract_strided_slice %8 {offsets = [0, 0], sizes = [18, 256], strides = [1, 1]} : vector<18x1024xf32> to vector<18x256xf32>
    %10 = vector.extract_strided_slice %8 {offsets = [0, 256], sizes = [18, 256], strides = [1, 1]} : vector<18x1024xf32> to vector<18x256xf32>
    %11 = arith.maximumf %9, %10 : vector<18x256xf32>
    %12 = vector.extract_strided_slice %8 {offsets = [0, 512], sizes = [18, 256], strides = [1, 1]} : vector<18x1024xf32> to vector<18x256xf32>
    %13 = vector.extract_strided_slice %8 {offsets = [0, 768], sizes = [18, 256], strides = [1, 1]} : vector<18x1024xf32> to vector<18x256xf32>
    %14 = arith.maximumf %12, %13 : vector<18x256xf32>
    %15 = arith.maximumf %11, %14 : vector<18x256xf32>
    %16 = vector.extract_strided_slice %15 {offsets = [0, 0], sizes = [1, 256], strides = [1, 1]} : vector<18x256xf32> to vector<1x256xf32>
    %17 = vector.extract_strided_slice %15 {offsets = [1, 0], sizes = [1, 256], strides = [1, 1]} : vector<18x256xf32> to vector<1x256xf32>
    %18 = vector.extract_strided_slice %15 {offsets = [2, 0], sizes = [1, 256], strides = [1, 1]} : vector<18x256xf32> to vector<1x256xf32>
    %19 = vector.extract_strided_slice %15 {offsets = [3, 0], sizes = [1, 256], strides = [1, 1]} : vector<18x256xf32> to vector<1x256xf32>
    %20 = vector.extract_strided_slice %15 {offsets = [4, 0], sizes = [1, 256], strides = [1, 1]} : vector<18x256xf32> to vector<1x256xf32>
    %21 = vector.extract_strided_slice %15 {offsets = [5, 0], sizes = [1, 256], strides = [1, 1]} : vector<18x256xf32> to vector<1x256xf32>
    %22 = vector.extract_strided_slice %15 {offsets = [6, 0], sizes = [1, 256], strides = [1, 1]} : vector<18x256xf32> to vector<1x256xf32>
    %23 = vector.extract_strided_slice %15 {offsets = [7, 0], sizes = [1, 256], strides = [1, 1]} : vector<18x256xf32> to vector<1x256xf32>
    %24 = vector.extract_strided_slice %15 {offsets = [8, 0], sizes = [1, 256], strides = [1, 1]} : vector<18x256xf32> to vector<1x256xf32>
    %25 = vector.extract_strided_slice %15 {offsets = [9, 0], sizes = [1, 256], strides = [1, 1]} : vector<18x256xf32> to vector<1x256xf32>
    %26 = vector.extract_strided_slice %15 {offsets = [10, 0], sizes = [1, 256], strides = [1, 1]} : vector<18x256xf32> to vector<1x256xf32>
    %27 = vector.extract_strided_slice %15 {offsets = [11, 0], sizes = [1, 256], strides = [1, 1]} : vector<18x256xf32> to vector<1x256xf32>
    %28 = vector.extract_strided_slice %15 {offsets = [12, 0], sizes = [1, 256], strides = [1, 1]} : vector<18x256xf32> to vector<1x256xf32>
    %29 = vector.extract_strided_slice %15 {offsets = [13, 0], sizes = [1, 256], strides = [1, 1]} : vector<18x256xf32> to vector<1x256xf32>
    %30 = vector.extract_strided_slice %15 {offsets = [14, 0], sizes = [1, 256], strides = [1, 1]} : vector<18x256xf32> to vector<1x256xf32>
    %31 = vector.extract_strided_slice %15 {offsets = [15, 0], sizes = [1, 256], strides = [1, 1]} : vector<18x256xf32> to vector<1x256xf32>
    %32 = vector.extract_strided_slice %15 {offsets = [16, 0], sizes = [1, 256], strides = [1, 1]} : vector<18x256xf32> to vector<1x256xf32>
    %33 = vector.extract_strided_slice %15 {offsets = [17, 0], sizes = [1, 256], strides = [1, 1]} : vector<18x256xf32> to vector<1x256xf32>
    %34 = tpu.concatenate %16, %17, %18, %19, %20, %21, %22, %23, %24, %25, %26, %27, %28, %29, %30, %31 in 1 : vector<1x256xf32>, vector<1x256xf32>, vector<1x256xf32>, vector<1x256xf32>, vector<1x256xf32>, vector<1x256xf32>, vector<1x256xf32>, vector<1x256xf32>, vector<1x256xf32>, vector<1x256xf32>, vector<1x256xf32>, vector<1x256xf32>, vector<1x256xf32>, vector<1x256xf32>, vector<1x256xf32>, vector<1x256xf32> -> vector<1x4096xf32>
    %35 = tpu.concatenate %32, %33 in 1 : vector<1x256xf32>, vector<1x256xf32> -> vector<1x512xf32>
    %36 = tpu.concatenate %34, %35 in 1 : vector<1x4096xf32>, vector<1x512xf32> -> vector<1x4608xf32>
    %37 = arith.truncf %36 : vector<1x4608xf32> to vector<1x4608xbf16>
    %c0_7 = arith.constant 0 : index
    %c0_8 = arith.constant 0 : index
    %38 = vector.load %arg4[%c0_7, %c0_8] : memref<4608x128xbf16, #tpu.memory_space<vmem>>, vector<4608x128xbf16>
    %cst_9 = arith.constant dense<0.000000e+00> : vector<1x128xf32>
    %39 = tpu.matmul %37, %38, %cst_9 {dimension_numbers = #tpu.dot_dimension_numbers<[1], [0], [0], [1], [0, 0, 1, 1], [], []>} : vector<1x4608xbf16>, vector<4608x128xbf16>, vector<1x128xf32> -> vector<1x128xf32>
    %c0_10 = arith.constant 0 : index
    %c0_11 = arith.constant 0 : index
    %40 = vector.load %arg5[%c0_10, %c0_11] : memref<1x128xf32, #tpu.memory_space<vmem>>, vector<1x128xf32>
    %41 = arith.addf %39, %40 : vector<1x128xf32>
    %cst_12 = arith.constant 0.000000e+00 : f32
    %42 = vector.broadcast %cst_12 : f32 to vector<1x128xf32>
    %43 = arith.maximumf %41, %42 : vector<1x128xf32>
    %44 = arith.truncf %43 : vector<1x128xf32> to vector<1x128xbf16>
    %c0_13 = arith.constant 0 : index
    %c0_14 = arith.constant 0 : index
    %45 = vector.load %arg6[%c0_13, %c0_14] : memref<128x10xbf16, #tpu.memory_space<vmem>>, vector<128x10xbf16>
    %cst_15 = arith.constant dense<0.000000e+00> : vector<1x10xf32>
    %46 = tpu.matmul %44, %45, %cst_15 {dimension_numbers = #tpu.dot_dimension_numbers<[1], [0], [0], [1], [0, 0, 1, 1], [], []>} : vector<1x128xbf16>, vector<128x10xbf16>, vector<1x10xf32> -> vector<1x10xf32>
    %c0_16 = arith.constant 0 : index
    %c0_17 = arith.constant 0 : index
    %47 = vector.load %arg7[%c0_16, %c0_17] : memref<1x10xf32, #tpu.memory_space<vmem>>, vector<1x10xf32>
    %48 = arith.addf %46, %47 : vector<1x10xf32>
    %c0_18 = arith.constant 0 : index
    %c0_19 = arith.constant 0 : index
    %c0_20 = arith.constant 0 : index
    %49 = vector.load %arg8[%c0_18, %c0_19, %c0_20] : memref<1x1x10xf32, #tpu.memory_space<vmem>>, vector<1x1x10xf32>
    %50 = vector.shape_cast %49 : vector<1x1x10xf32> to vector<1x10xf32>
    %51 = vector.shape_cast %48 : vector<1x10xf32> to vector<1x1x10xf32>
    tpu.vector_store %arg8[%c0_18, %c0_19, %c0_20], %51 {strides = array<i32>} : memref<1x1x10xf32, #tpu.memory_space<vmem>>, vector<1x1x10xf32>,
    return
  }
  func.func @transform_0(%arg0: i32) -> (i32, i32, i32) {
    %c0_i32 = arith.constant 0 : i32
    %c0_i32_0 = arith.constant 0 : i32
    %c0_i32_1 = arith.constant 0 : i32
    return %arg0, %c0_i32, %c0_i32_0 : i32, i32, i32
  }
  func.func @transform_1(%arg0: i32) -> (i32, i32) {
    %c0_i32 = arith.constant 0 : i32
    %c0_i32_0 = arith.constant 0 : i32
    %c0_i32_1 = arith.constant 0 : i32
    return %c0_i32, %c0_i32_0 : i32, i32
  }
  func.func @transform_2(%arg0: i32) -> (i32, i32) {
    %c0_i32 = arith.constant 0 : i32
    %c0_i32_0 = arith.constant 0 : i32
    %c0_i32_1 = arith.constant 0 : i32
    return %c0_i32, %c0_i32_0 : i32, i32
  }
  func.func @transform_3(%arg0: i32) -> (i32, i32) {
    %c0_i32 = arith.constant 0 : i32
    %c0_i32_0 = arith.constant 0 : i32
    %c0_i32_1 = arith.constant 0 : i32
    return %c0_i32, %c0_i32_0 : i32, i32
  }
  func.func @transform_4(%arg0: i32) -> (i32, i32) {
    %c0_i32 = arith.constant 0 : i32
    %c0_i32_0 = arith.constant 0 : i32
    %c0_i32_1 = arith.constant 0 : i32
    return %c0_i32, %c0_i32_0 : i32, i32
  }
  func.func @transform_5(%arg0: i32) -> (i32, i32) {
    %c0_i32 = arith.constant 0 : i32
    %c0_i32_0 = arith.constant 0 : i32
    %c0_i32_1 = arith.constant 0 : i32
    return %c0_i32, %c0_i32_0 : i32, i32
  }
  func.func @transform_6(%arg0: i32) -> (i32, i32) {
    %c0_i32 = arith.constant 0 : i32
    %c0_i32_0 = arith.constant 0 : i32
    %c0_i32_1 = arith.constant 0 : i32
    return %c0_i32, %c0_i32_0 : i32, i32
  }
  func.func @transform_7(%arg0: i32) -> (i32, i32, i32) {
    %c0_i32 = arith.constant 0 : i32
    %c0_i32_0 = arith.constant 0 : i32
    %c0_i32_1 = arith.constant 0 : i32
    return %arg0, %c0_i32, %c0_i32_0 : i32, i32, i32
  }
}

</mosaic_0001>

<bundles_post_ra>
// kernel: simple_cnn_forward.1
= control target key start
LH: loop header
LB: loop body
LE: loop exit
PB: predicated region body
PF: predicated region fallthrough
CT: control target
= control target key end

     0   :  { %12 = vsyncpa [#allocation3], 0  ;;  %s6303_s0 = inlined_call_operand.vmem [shape: bf16[2,27,1024], index: 0, kind: input, shape index: {}]   ;;  %s6304_s1 = inlined_call_operand.vmem [shape: bf16[18,27], index: 1, kind: input, shape index: {}]   ;;  %s6305_s2 = inlined_call_operand.vmem [shape: f32[18,1], index: 2, kind: input, shape index: {}]   ;;  %s6306_s3 = inlined_call_operand.vmem [shape: bf16[4608,128], index: 3, kind: input, shape index: {}]   ;;  %s6307_s4 = inlined_call_operand.vmem [shape: f32[1,128], index: 4, kind: input, shape index: {}]   ;;  %s6308_s5 = inlined_call_operand.vmem [shape: bf16[128,10], index: 5, kind: input, shape index: {}]   ;;  %s6309_s6 = inlined_call_operand.vmem [shape: f32[1,10], index: 6, kind: input, shape index: {}]   ;;  %s6310_s7 = inlined_call_operand.hbm [shape: f32[2,1,10], index: 7, kind: output, shape index: {}]  }
   0x1   :  { %14 = vsyncpa [#allocation3 + $0x1], 0  ;;  %s5188_s24 = smov 0   ;;  %s5190_s25 = smov 0  }
   0x2   :  { %s5192_s26 = smov 0   ;;  %s5194_s27 = smov 0  }
   0x3 LB: > { %s5209_s28 = sadd.s32 4294967295, %s5141_s27   ;;  %s3979_s29 = sadd.s32 4294967294, %s5141_s27   ;;  %s5141_s27 = sphi %s5194_s27, %s6316_s27   ;;  %s5137_s26 = sphi %s5192_s26, %s6315_s26   ;;  %s5133_s25 = sphi %s5190_s25, %s6314_s25   ;;  %s5129_s24 = sphi %s5188_s24, %s6313_s24  }
   0x4   : > { %s5213_s30 = sadd.s32 1, %s5141_s27   ;;  %s179_s8 = sadd.s32 1, %s5137_s26 }
   0x5   : > { %s176_s9 = ssub.s32 %s5141_s27, %s5213_s30  ;;  %p189_p0 = scmp.ne.s32.totalorder %s5137_s26, %s5133_s25 }
   0x6   : > { %p177_p1 = scmp.eq.s32.totalorder %s176_s9, 0  ;;  %p190_p2 = scmp.eq.s32.totalorder %s5209_s28, 1 }
   0x7   : > { %p195_p3 = scmp.ne.s32.totalorder %s5133_s25, %s5129_s24  ;;  %p196_p4 = scmp.eq.s32.totalorder %s3979_s29, 1 }
   0x8   : > { %s5224_s10 = scalar_select %p177_p1, %s5137_s26, %s179_s8  }
   0x9   : > { %p5226_p5 = por %p190_p2, %p189_p0  ;;  %p5230_p6 = por %p196_p4, %p195_p3 }
   0xa   : > { %p3982_p7 = scmp.ge.s32.totalorder %s5141_s27, 1  ;;  %p240_p8 = scmp.lt.s32.totalorder %s5141_s27, 3 }
   0xc   : > { %p241_p9 = pnand %p3982_p7, %p240_p8 }
   0xd   : > { %p271_p10 = scmp.lt.s32.totalorder (!%p241_p9), %s5209_s28, 1  ;;  %vm401_vm0 = vcmask (!%p241_p9), 1044480   ;;  %v5143_v0 = vmov (!%p241_p9), 0   ;;  %v296_v1 = vld [vmem:[%s6305_s2] sm:$0xff] (!%p241_p9)  ;;  %vm402_vm1 = vcmask (!%p241_p9), 1045504   ;;  %v5144_v2 = vmov (!%p241_p9), 65535  }
   0xe   : > { %244 = sbr.rel (%p241_p9) target bundleno = 1000 (0x3e8), region = 48  ;;  %461 = vmatprep.mubr.bf16.mxu1 (!%p241_p9), %v5143_v0  ;;  %563 = vmatprep.mubr.bf16.mxu0 (!%p241_p9), %v5143_v0  ;;  %v403_v3 = vsel (!%p241_p9), %vm401_vm0, 4294967295, %v5144_v2  ;;  %v298_v4 = vld [vmem:[%s6305_s2 + $0x10] sm:$0x3] (!%p241_p9)  ;;  %v297_v5 = vld [vmem:[%s6305_s2 + $0x8] sm:$0xff] (!%p241_p9)  ;;  %vm394_vm2 = vcmask (!%p241_p9), 220160  }
   0xf   : > { %4779 = vset.pattern.permute.xlu0 (!%p241_p9), %v5143_v0  ;;  %4780 = vset.pattern.permute.xlu1 (!%p241_p9), %v5143_v0  ;;  %v404_v12 = vsel (!%p241_p9), %vm402_vm1, %v403_v3, 0  ;;  %v4781_v24 = vld [vmem:[%s6304_s1] sm:$0xff] (!%p241_p9)   ;;  %v4782_v40 = vld [vmem:[%s6304_s1 + $0x8] ss:$0 sps:$4 sm:$0x11] (!%p241_p9)   ;;  %v4791_v57 = vld [vmem:[%s6306_s3 + $0x50] sm:$0xff] (!%p241_p9)  }
  0x10   : > { %301 = vperm.xlu0 (!%p241_p9), %4779, %v296_v1   ;;  %311 = vperm.xlu1 (!%p241_p9), %4780, %v298_v4   ;;  %v4783_v49 = vld [vmem:[%s6306_s3 + $0x40] sm:$0xff] (!%p241_p9)   ;;  %v4787_v53 = vld [vmem:[%s6306_s3 + $0x48] sm:$0xff] (!%p241_p9)   ;;  %v4792_v58 = vld [vmem:[%s6306_s3 + $0x10] sm:$0xff] (!%p241_p9)   ;;  %vm5146_vm3 = vmmov (!%p241_p9), 0   ;;  %s269_s20 = sand.u32 (!%p241_p9), 1, %s5133_s25   ;;  %vm3909_vm4 = vcmask (!%p241_p9), 73728  }
  0x11   : > { %v4784_v50 = vld [vmem:[%s6306_s3] sm:$0xff] (!%p241_p9)   ;;  %v4788_v54 = vld [vmem:[%s6306_s3 + $0x8] sm:$0xff] (!%p241_p9)   ;;  %v4793_v59 = vld [vmem:[%s6306_s3 + $0xd0] sm:$0xff] (!%p241_p9)   ;;  %s270_s29 = scalar_lea.vmem (!%p241_p9), [#allocation2], %s269_s20  ;;  %s5147_s16 = smov (!%p241_p9), [#allocation2]  }
  0x12   : > { %v4785_v51 = vld [vmem:[%s6306_s3 + $0xc0] sm:$0xff] (!%p241_p9)   ;;  %v4789_v55 = vld [vmem:[%s6306_s3 + $0xc8] sm:$0xff] (!%p241_p9)   ;;  %v4794_v60 = vld [vmem:[%s6306_s3 + $0x90] sm:$0xff] (!%p241_p9)   ;;  %s3924_s8 = sshll.u32 (!%p241_p9), %s270_s29, 4  ;;  %s5083_s17 = sshll.u32 (!%p241_p9), %s5147_s16, 4  ;;  %s6263_s8 = int_to_ptr.vmem [resolvable:$true] %s3924_s8  ;;  %s5084_s17 = int_to_ptr.vmem [resolvable:$false] %s5083_s17 }
  0x13   : > { %v4786_v52 = vld [vmem:[%s6306_s3 + $0x80] sm:$0xff] (!%p241_p9)   ;;  %v4790_v56 = vld [vmem:[%s6306_s3 + $0x88] sm:$0xff] (!%p241_p9)   ;;  %v4795_v61 = vld [vmem:[%s6306_s3 + $0x58] sm:$0xff] (!%p241_p9)   ;;  %s5079_s15 = scalar_lea.vmem (!%p241_p9), %s6263_s8, 16  ;;  %p5086_p0 = scmp.lt.s32.totalorder (!%p241_p9), %s6263_s8, %s5084_s17 }
  0x14   : > { %306 = vperm.xlu0 (!%p241_p9), %4779, %v297_v5   ;;  %v4796_v62 = vld [vmem:[%s6306_s3 + $0x18] sm:$0xff] (!%p241_p9)   ;;  %v4799_v1 = vld [vmem:[%s6306_s3 + $0x60] sm:$0xff] (!%p241_p9)   ;;  %v4803_v5 = vld [vmem:[%s6306_s3 + $0x68] sm:$0xff] (!%p241_p9)   ;;  %p5080_p11 = scmp.ne.s32.totalorder (!%p241_p9), %s6263_s8, %s5079_s15 }
  0x15   : > { %s272_s13 = scalar_select %p271_p10, %s5209_s28, 1  ;;  %v4797_v63 = vld [vmem:[%s6306_s3 + $0xd8] sm:$0xff]   ;;  %v4800_v2 = vld [vmem:[%s6306_s3 + $0x20] sm:$0xff]  }
  0x16   : > { %v4801_v3 = vld [vmem:[%s6306_s3 + $0xe0] sm:$0xff]   ;;  %p5081_p12 = pnand %p5080_p11, %p5226_p5 }
  0x17   : > { %s4310_s18 = sshll.u32 %s272_s13, 7  ;;  %v4802_v4 = vld [vmem:[%s6306_s3 + $0xa0] sm:$0xff]  }
  0x18   : > { %s5254_s23 = scalar_lea.vmem %s6303_s0, %s4310_s18  ;;  %p5082_p13 = pneg %p5081_p12 }
  0x19   : > { %v277_v6 = vld [vmem:[%s5254_s23] sm:$0xff]  ;;  %v278_v13 = vld [vmem:[%s5254_s23 + $0x8] sm:$0xff]  ;;  %v279_v19 = vld [vmem:[%s5254_s23 + $0x10] sm:$0xff]  ;;  %s5085_s18 = scalar_lea.vmem %s5084_s17, 32 }
  0x1a   : > { %v281_v7 = vld [vmem:[%s5254_s23 + $0x20] sm:$0xff]  ;;  %v282_v16 = vld [vmem:[%s5254_s23 + $0x28] sm:$0xff]  ;;  %v283_v20 = vld [vmem:[%s5254_s23 + $0x30] sm:$0xff]  ;;  %p5087_p1 = scmp.lt.s32.totalorder %s5085_s18, %s5079_s15 }
  0x1b   : > { %v285_v8 = vld [vmem:[%s5254_s23 + $0x40] sm:$0xff]  ;;  %v3988_v9 = vcombine.high %v277_v6, %v281_v7  ;;  %v3987_v10 = vcombine.low %v277_v6, %v281_v7  ;;  %v286_v17 = vld [vmem:[%s5254_s23 + $0x48] sm:$0xff]  ;;  %v287_v23 = vld [vmem:[%s5254_s23 + $0x50] sm:$0xff]  ;;  %v3990_v25 = vcombine.high %v278_v13, %v282_v16  ;;  %v3992_v27 = vcombine.high %v279_v19, %v283_v20 }
  0x1c   : > { %v289_v11 = vld [vmem:[%s5254_s23 + $0x60] sm:$0x33]  ;;  %v290_v18 = vld [vmem:[%s5254_s23 + $0x68] sm:$0x33]  ;;  %v3991_v28 = vcombine.low %v279_v19, %v283_v20  ;;  %v291_v29 = vld [vmem:[%s5254_s23 + $0x70] sm:$0x33]  ;;  %v3989_v32 = vcombine.low %v278_v13, %v282_v16  ;;  %p5088_p2 = por %p5087_p1, %p5086_p0 }
  0x1d   : > { %v3996_v14 = vcombine.high %v285_v8, %v289_v11  ;;  %v3995_v15 = vcombine.low %v285_v8, %v289_v11  ;;  %429 = vmatprep.subr.bf16.mxu1 %v3988_v9  ;;  %v3998_v26 = vcombine.high %v286_v17, %v290_v18  ;;  %v4000_v30 = vcombine.high %v287_v23, %v291_v29  ;;  %v280_v34 = vld [vmem:[%s5254_s23 + $0x18] sm:$0xff]  ;;  %v4804_v6 = vld [vmem:[%s6306_s3 + $0x28] sm:$0xff]   ;;  %v4807_v9 = vld [vmem:[%s6306_s3 + $0x70] sm:$0xff]  }
  0x1e   : > { %430 = vmatpush1.bf16.msra.mxu1 %v3987_v10  ;;  %v3999_v31 = vcombine.low %v287_v23, %v291_v29  ;;  %531 = vmatprep.subr.bf16.mxu0 %v3992_v27  ;;  %v3997_v33 = vcombine.low %v286_v17, %v290_v18  ;;  %v284_v35 = vld [vmem:[%s5254_s23 + $0x38] sm:$0xff]  ;;  %v4805_v7 = vld [vmem:[%s6306_s3 + $0xe8] sm:$0xff]   ;;  %v4808_v10 = vld [vmem:[%s6306_s3 + $0x30] sm:$0xff]   ;;  %p5089_p3 = pnand %p5088_p2, %p5082_p13 }
  0x1f   : > { %v409_v21 = vand.u32 %v3996_v14, %v404_v12  ;;  %v406_v22 = vand.u32 %v3995_v15, %v404_v12  ;;  %532 = vmatpush1.bf16.msra.mxu0 %v3991_v28  ;;  %v421_v36 = vand.u32 %v4000_v30, %v404_v12  ;;  %v415_v37 = vand.u32 %v3998_v26, %v404_v12  ;;  %v288_v42 = vld [vmem:[%s5254_s23 + $0x58] sm:$0xff]  ;;  %v4806_v8 = vld [vmem:[%s6306_s3 + $0xa8] sm:$0xff]   ;;  %v4809_v11 = vld [vmem:[%s6306_s3 + $0xf0] sm:$0xff]  }
  0x20   : > { %v418_v38 = vand.u32 %v3999_v31, %v404_v12  ;;  %v412_v39 = vand.u32 %v3997_v33, %v404_v12  ;;  %v3994_v41 = vcombine.high %v280_v34, %v284_v35  ;;  %v292_v43 = vld [vmem:[%s5254_s23 + $0x78] sm:$0x33]  ;;  %v3993_v45 = vcombine.low %v280_v34, %v284_v35  ;;  %v4815_v17 = vld [vmem:[%s6306_s3 + $0x140] sm:$0xff]   ;;  %s4307_s23 = sshll.u32 %s5209_s28, 4  ;;  %s3912_s28 = scalar_lea.sflag [#allocation3], %s269_s20 }
  0x21   : > { %431 = vmatprep.subr.bf16.mxu1 %v409_v21  ;;  %533 = vmatprep.subr.bf16.mxu0 %v421_v36  ;;  %v4002_v44 = vcombine.high %v288_v42, %v292_v43  ;;  %v4001_v46 = vcombine.low %v288_v42, %v292_v43  ;;  %v4811_v13 = vld [vmem:[%s6306_s3 + $0x78] sm:$0xff]   ;;  %v4817_v18 = vld [vmem:[%s6306_s3 + $0x1c0] sm:$0xff]   ;;  %s6261_s14 = scalar_lea.hbm %s6310_s7, %s4307_s23 }
  0x22   : > { %432 = vmatpush1.bf16.msra.mxu1 %v406_v22  ;;  %v4812_v14 = vld [vmem:[%s6306_s3 + $0x38] sm:$0xff]  }
  0x23   : > { %480 = vmatprep.subr.bf16.mxu1 %v3990_v25  ;;  %534 = vmatpush1.bf16.msra.mxu0 %v418_v38  ;;  %v427_v47 = vand.u32 %v4002_v44, %v404_v12  ;;  %v424_v48 = vand.u32 %v4001_v46, %v404_v12  ;;  %v4810_v12 = vld [vmem:[%s6306_s3 + $0xb0] sm:$0xff]   ;;  %v4813_v15 = vld [vmem:[%s6306_s3 + $0xf8] sm:$0xff]  }
  0x24   : > { %4311 = vmatprep.subr.bf16.mxu0 %v4783_v49  ;;  %v4814_v16 = vld [vmem:[%s6306_s3 + $0xb8] sm:$0xff]  }
  0x25   : > { %4003 = vmatmul.mubr.msk.bf16.vlgmr.msra.gmra.mrb[0].mxu1 %vm394_vm2, %v4781_v24 }
  0x26   : > { %481 = vmatpush1.bf16.msra.mxu1 %v3989_v32  ;;  %471 = vmatprep.mubr.bf16.mxu1 %v5143_v0 }
  0x27   : > { %482 = vmatprep.subr.bf16.mxu1 %v415_v37  ;;  %4007 = vmatmul.mubr.msk.bf16.vlgmr.msra.gmra.mrb[0].mxu0 %vm394_vm2, %v4781_v24 }
  0x28   : > { %573 = vmatprep.mubr.bf16.mxu0 %v5143_v0  ;;  %4312 = vmatpush3.bf16.msra.mxu0 %v4784_v50 }
  0x29   : > { %4313 = vmatprep.subr.bf16.mxu0 %v4787_v53 }
  0x2a   : > { %483 = vmatpush1.bf16.msra.mxu1 %v412_v39 }
  0x2b   : > { %582 = vmatprep.subr.bf16.mxu1 %v3994_v41 }
  0x2c   : > { %4314 = vmatpush3.bf16.msra.mxu0 %v4788_v54 }
  0x2d   : > { %4004 = vmatmul.mubr.msk.bf16.gmra.mrb[4].mxu1 %vm394_vm2, %v4782_v40  ;;  %4315 = vmatprep.subr.bf16.mxu0 %v4791_v57 }
  0x2e   : > { %512 = vmatprep.mubr.bf16.mxu1 %v5143_v0 }
  0x2f   : > { %4008 = vmatmul.mubr.msk.bf16.gmra.mrb[4].mxu0 %vm394_vm2, %v4782_v40 }
  0x30   : > { %4316 = vmatpush3.bf16.msra.mxu0 %v4792_v58 }
  0x31   : > { %4317 = vmatprep.subr.bf16.mxu0 %v4795_v61 }
  0x34   : > { %4318 = vmatpush3.bf16.msra.mxu0 %v4796_v62 }
  0x35   : > { %4005 = vmatmul.mubr.msk.bf16.vlgmr.msra.gmra.mrb[8].mxu1 %vm394_vm2, %v4781_v24  ;;  %4319 = vmatprep.subr.bf16.mxu0 %v4799_v1 }
  0x36   : > { %583 = vmatpush1.bf16.msra.mxu1 %v3993_v45  ;;  %522 = vmatprep.mubr.bf16.mxu1 %v5143_v0 }
  0x37   : > { %584 = vmatprep.subr.bf16.mxu1 %v427_v47 }
  0x38   : > { %4320 = vmatpush3.bf16.msra.mxu0 %v4800_v2 }
  0x39   : > { %4321 = vmatprep.subr.bf16.mxu0 %v4803_v5 }
  0x3a   : > { %585 = vmatpush1.bf16.msra.mxu1 %v424_v48 }
  0x3b   : > { %4333 = vmatprep.subr.bf16.mxu1 %v4785_v51 }
  0x3c   : > { %4322 = vmatpush3.bf16.msra.mxu0 %v4804_v6 }
  0x3d   : > { %4006 = vmatmul.mubr.msk.bf16.gmra.mrb[12].mxu1 %vm394_vm2, %v4782_v40  ;;  %4323 = vmatprep.subr.bf16.mxu0 %v4807_v9 }
  0x3e   : > { %614 = vmatprep.mubr.bf16.mxu1 %v5143_v0 }
  0x40   : > { %4324 = vmatpush3.bf16.msra.mxu0 %v4808_v10 }
  0x41   : > { %4325 = vmatprep.subr.bf16.mxu0 %v4811_v13 }
  0x44   : > { %4326 = vmatpush3.bf16.msra.mxu0 %v4812_v14 }
  0x45   : > { %4009 = vmatmul.mubr.msk.bf16.vlgmr.msra.gmra.mrb[16].mxu1 %vm394_vm2, %v4781_v24  ;;  %4355 = vmatprep.subr.bf16.mxu0 %v4815_v17 }
  0x46   : > { %624 = vmatprep.mubr.bf16.mxu1 %v5143_v0  ;;  %4334 = vmatpush3.bf16.msra.mxu1 %v4786_v52  ;;  %v4798_v0 = vld [vmem:[%s6306_s3 + $0x98] sm:$0xff]  }
  0x47   : > { %4335 = vmatprep.subr.bf16.mxu1 %v4789_v55 }
  0x4a   : > { %4336 = vmatpush3.bf16.msra.mxu1 %v4790_v56 }
  0x4b   : > { %4337 = vmatprep.subr.bf16.mxu1 %v4793_v59 }
  0x4d   : > { %4010 = vmatmul.mubr.msk.bf16.gmra.mrb[20].mxu1 %vm394_vm2, %v4782_v40 }
  0x4e   : > { %4338 = vmatpush3.bf16.msra.mxu1 %v4794_v60 }
  0x4f   : > { %4339 = vmatprep.subr.bf16.mxu1 %v4797_v63 }
  0x52   : > { %4340 = vmatpush3.bf16.msra.mxu1 %v4798_v0 }
  0x53   : > { %4341 = vmatprep.subr.bf16.mxu1 %v4801_v3 }
  0x56   : > { %4342 = vmatpush3.bf16.msra.mxu1 %v4802_v4 }
  0x57   : > { %4343 = vmatprep.subr.bf16.mxu1 %v4805_v7 }
  0x5a   : > { %4344 = vmatpush3.bf16.msra.mxu1 %v4806_v8 }
  0x5b   : > { %4345 = vmatprep.subr.bf16.mxu1 %v4809_v11 }
  0x5e   : > { %4346 = vmatpush3.bf16.msra.mxu1 %v4810_v12 }
  0x5f   : > { %4347 = vmatprep.subr.bf16.mxu1 %v4813_v15 }
  0x62   : > { %4348 = vmatpush3.bf16.msra.mxu1 %v4814_v16 }
  0x63   : > { %4377 = vmatprep.subr.bf16.mxu1 %v4817_v18 }
  0x8f   : > { %v302_v25 = vpop.permute.xlu0 %301  ;;  %v5394_v47 = vpop.permute.xlu1 %311 }
  0x93   : > { %v307_v34 = vpop.permute.xlu0 %306 }
  0xf8   : > { %v463_v19 = vpop.f32.mrb[0].mxu1 }
  0xf9   : > { %v465_v20 = vpop.f32.mrb[1].mxu1  ;;  %v464_v33 = vadd.f32 %v463_v19, %v302_v25 }
  0xfa   : > { %v467_v21 = vpop.f32.mrb[2].mxu1  ;;  %v565_v23 = vpop.f32.mrb[0].mxu0  ;;  %v466_v37 = vadd.f32 %v465_v20, %v302_v25 }
  0xfb   : > { %v469_v22 = vpop.f32.mrb[3].mxu1  ;;  %v567_v24 = vpop.f32.mrb[1].mxu0  ;;  %v468_v40 = vadd.f32 %v467_v21, %v307_v34  ;;  %v633_v43 = vmax.f32 %v464_v33, 0.0  ;;  %v566_v11 = vadd.f32 %v565_v23, %v302_v25 }
  0xfc   : > { %v569_v26 = vpop.f32.mrb[2].mxu0  ;;  %v470_v44 = vadd.f32 %v469_v22, %v307_v34  ;;  %v634_v51 = vmax.f32 %v466_v37, 0.0  ;;  %v568_v13 = vadd.f32 %v567_v24, %v302_v25 }
  0xfd   : > { %v571_v28 = vpop.f32.mrb[3].mxu0  ;;  %v641_v54 = vmax.f32 %v468_v40, 0.0  ;;  %v637_v15 = vmax.f32 %v566_v11, 0.0  ;;  %v570_v16 = vadd.f32 %v569_v26, %v307_v34  ;;  %v4827_v11 = vld [vmem:[%s6306_s3 + $0x158] sm:$0xff]  }
  0xfe   : > { %v642_v57 = vmax.f32 %v470_v44, 0.0  ;;  %v638_v19 = vmax.f32 %v568_v13, 0.0  ;;  %v572_v20 = vadd.f32 %v571_v28, %v307_v34  ;;  %v4829_v13 = vld [vmem:[%s6306_s3 + $0x1d8] sm:$0xff]  }
  0xff   : > { %v645_v23 = vmax.f32 %v570_v16, 0.0  ;;  %v4830_v16 = vld [vmem:[%s6306_s3 + $0x198] sm:$0xff]  }
 0x100   : > { %v473_v27 = vpop.f32.mrb[4].mxu1 }
 0x101   : > { %v475_v29 = vpop.f32.mrb[5].mxu1  ;;  %v474_v60 = vadd.f32 %v473_v27, %v5394_v47 }
 0x102   : > { %v477_v30 = vpop.f32.mrb[6].mxu1  ;;  %v575_v32 = vpop.f32.mrb[4].mxu0  ;;  %v476_v62 = vadd.f32 %v475_v29, %v5394_v47 }
 0x103   : > { %v478_v31 = vpop.f32.mrb[7].mxu1  ;;  %v577_v35 = vpop.f32.mrb[5].mxu0  ;;  %v649_v3 = vmax.f32 %v474_v60, 0.0  ;;  %v4818_v60 = vld [vmem:[%s6306_s3 + $0x180] sm:$0xff]  }
 0x104   : > { %v579_v36 = vpop.f32.mrb[6].mxu0  ;;  %v650_v8 = vmax.f32 %v476_v62, 0.0  ;;  %v578_v24 = vadd.f32 %v577_v35, %v5394_v47 }
 0x105   : > { %v580_v39 = vpop.f32.mrb[7].mxu0  ;;  %v576_v36 = vadd.f32 %v575_v32, %v5394_v47 }
 0x106   : > { %v646_v39 = vmax.f32 %v572_v20, 0.0  ;;  %v4834_v20 = vld [vmem:[%s6306_s3 + $0x1a0] sm:$0xff]  }
 0x108   : > { %v514_v38 = vpop.f32.mrb[8].mxu1 }
 0x109   : > { %v515_v41 = vadd.f32 %v514_v38, %v302_v25  ;;  %v516_v42 = vpop.f32.mrb[9].mxu1 }
 0x10a   : > { %v517_v45 = vadd.f32 %v516_v42, %v302_v25  ;;  %v518_v46 = vpop.f32.mrb[10].mxu1 }
 0x10b   : > { %v635_v48 = vmax.f32 %v515_v41, 0.0  ;;  %v519_v49 = vadd.f32 %v518_v46, %v307_v34  ;;  %v520_v50 = vpop.f32.mrb[11].mxu1 }
 0x10c   : > { %v636_v52 = vmax.f32 %v517_v45, 0.0  ;;  %v521_v53 = vadd.f32 %v520_v50, %v307_v34 }
 0x10d   : > { %v657_v55 = vmax.f32 %v633_v43, %v635_v48  ;;  %v643_v56 = vmax.f32 %v519_v49, 0.0  ;;  %v653_v43 = vmax.f32 %v576_v36, 0.0  ;;  %v4842_v36 = vld [vmem:[%s6306_s3 + $0x1b0] sm:$0xff]  }
 0x10e   : > { %v658_v58 = vmax.f32 %v634_v51, %v636_v52  ;;  %v644_v59 = vmax.f32 %v521_v53, 0.0  ;;  %v4816_v51 = vld [vmem:[%s6306_s3 + $0x100] sm:$0xff]  }
 0x10f   : > { %v659_v61 = vmax.f32 %v641_v54, %v643_v56 }
 0x110   : > { %v660_v63 = vmax.f32 %v642_v57, %v644_v59  ;;  %v524_v0 = vpop.f32.mrb[12].mxu1 }
 0x111   : > { %v525_v1 = vadd.f32 %v524_v0, %v5394_v47  ;;  %v526_v2 = vpop.f32.mrb[13].mxu1 }
 0x112   : > { %v527_v4 = vadd.f32 %v526_v2, %v5394_v47  ;;  %v528_v5 = vpop.f32.mrb[14].mxu1 }
 0x113   : > { %v651_v6 = vmax.f32 %v525_v1, 0.0  ;;  %v529_v7 = vpop.f32.mrb[15].mxu1  ;;  %v4821_v1 = vld [vmem:[%s6306_s3 + $0x1c8] sm:$0xff]  }
 0x114   : > { %v652_v9 = vmax.f32 %v527_v4, 0.0 }
 0x115   : > { %v661_v10 = vmax.f32 %v649_v3, %v651_v6  ;;  %v4820_v3 = vld [vmem:[%s6306_s3 + $0x108] sm:$0xff]   ;;  %v4823_v6 = vld [vmem:[%s6306_s3 + $0x150] sm:$0xff]  }
 0x116   : > { %v5400_v12 = vmax.f32 %v650_v8, %v652_v9  ;;  %v4822_v8 = vld [vmem:[%s6306_s3 + $0x188] sm:$0xff]   ;;  %v4825_v9 = vld [vmem:[%s6306_s3 + $0x1d0] sm:$0xff]  }
 0x118   : > { %v616_v14 = vpop.f32.mrb[16].mxu1 }
 0x119   : > { %v617_v17 = vadd.f32 %v616_v14, %v302_v25  ;;  %v618_v18 = vpop.f32.mrb[17].mxu1  ;;  %v4828_v14 = vld [vmem:[%s6306_s3 + $0x118] sm:$0xff]  }
 0x11a   : > { %v619_v21 = vadd.f32 %v618_v18, %v302_v25  ;;  %v620_v22 = vpop.f32.mrb[18].mxu1  ;;  %v4832_v18 = vld [vmem:[%s6306_s3 + $0x120] sm:$0xff]  }
 0x11b   : > { %v639_v27 = vmax.f32 %v617_v17, 0.0  ;;  %v621_v29 = vadd.f32 %v620_v22, %v307_v34  ;;  %v622_v30 = vpop.f32.mrb[19].mxu1  ;;  %v4833_v17 = vld [vmem:[%s6306_s3 + $0x1e0] sm:$0xff]   ;;  %v4836_v22 = vld [vmem:[%s6306_s3 + $0x128] sm:$0xff]  }
 0x11c   : > { %v640_v31 = vmax.f32 %v619_v21, 0.0  ;;  %v623_v33 = vadd.f32 %v622_v30, %v307_v34  ;;  %v654_v34 = vmax.f32 %v578_v24, 0.0  ;;  %v4837_v21 = vld [vmem:[%s6306_s3 + $0x1e8] sm:$0xff]   ;;  %v4841_v30 = vld [vmem:[%s6306_s3 + $0x1f0] sm:$0xff]   ;;  %v4847_v24 = vld [vmem:[%s6306_s3 + $0x240] sm:$0xff]  }
 0x11d   : > { %v663_v37 = vmax.f32 %v637_v15, %v639_v27  ;;  %v647_v38 = vmax.f32 %v621_v29, 0.0  ;;  %v4831_v15 = vld [vmem:[%s6306_s3 + $0x160] sm:$0xff]   ;;  %v4839_v27 = vld [vmem:[%s6306_s3 + $0x170] sm:$0xff]   ;;  %v4838_v29 = vld [vmem:[%s6306_s3 + $0x1a8] sm:$0xff]  }
 0x11e   : > { %v664_v26 = vmax.f32 %v638_v19, %v640_v31  ;;  %v648_v40 = vmax.f32 %v623_v33, 0.0  ;;  %v4835_v19 = vld [vmem:[%s6306_s3 + $0x168] sm:$0xff]   ;;  %v4840_v31 = vld [vmem:[%s6306_s3 + $0x130] sm:$0xff]   ;;  %v4843_v33 = vld [vmem:[%s6306_s3 + $0x178] sm:$0xff]  }
 0x11f   : > { %v5404_v41 = vmax.f32 %v657_v55, %v663_v37  ;;  %v665_v28 = vmax.f32 %v645_v23, %v647_v38  ;;  %v4845_v23 = vld [vmem:[%s6306_s3 + $0x1f8] sm:$0xff]  }
 0x120   : > { %v5406_v25 = vmax.f32 %v658_v58, %v664_v26  ;;  %v666_v42 = vmax.f32 %v646_v39, %v648_v40  ;;  %v626_v44 = vpop.f32.mrb[20].mxu1  ;;  %v4844_v37 = vld [vmem:[%s6306_s3 + $0x138] sm:$0xff]  }
 0x121   : > { %v5408_v45 = vmax.f32 %v659_v61, %v665_v28  ;;  %v627_v32 = vadd.f32 %v626_v44, %v5394_v47  ;;  %v628_v46 = vpop.f32.mrb[21].mxu1  ;;  %v677_v48 = vrot.slane %v5404_v41, 1  ;;  %v741_v55 = vpack.c.bf16 %v5404_v41, %v5404_v41  ;;  %v4819_v61 = vld [vmem:[%s6306_s3 + $0x148] sm:$0xff]   ;;  %v4846_v39 = vld [vmem:[%s6306_s3 + $0x1b8] sm:$0xff]   ;;  %v4849_v28 = vld [vmem:[%s6306_s3 + $0x2c0] sm:$0xff]  }
 0x122   : > { %v5412_v35 = vmax.f32 %v660_v63, %v666_v42  ;;  %v629_v49 = vadd.f32 %v628_v46, %v5394_v47  ;;  %v742_v50 = vpack.c.bf16 %v5406_v25, %v5406_v25  ;;  %v678_v52 = vrot.slane %v5406_v25, 1  ;;  %v630_v53 = vpop.f32.mrb[22].mxu1  ;;  %v4848_v42 = vld [vmem:[%s6306_s3 + $0x200] sm:$0xff]  }
 0x123   : > { %v655_v54 = vmax.f32 %v627_v32, 0.0  ;;  %v682_v56 = vrot.slane %v5406_v25, 2  ;;  %v686_v57 = vrot.slane %v5406_v25, 3  ;;  %v631_v58 = vpop.f32.mrb[23].mxu1  ;;  %v743_v0 = vpack.c.bf16 %v677_v48, %v677_v48  ;;  %v4851_v32 = vld [vmem:[%s6306_s3 + $0x248] sm:$0xff]   ;;  %v4850_v46 = vld [vmem:[%s6306_s3 + $0x280] sm:$0xff]  }
 0x124   : > { %v656_v47 = vmax.f32 %v629_v49, 0.0  ;;  %3114 = vmatprep.mubr.bf16.mxu0 %v742_v50  ;;  %v744_v59 = vpack.c.bf16 %v678_v52, %v678_v52  ;;  %v681_v38 = vrot.slane %v5404_v41, 2  ;;  %v690_v26 = vrot.slane %v5406_v25, 4  ;;  %v4853_v49 = vld [vmem:[%s6306_s3 + $0x2c8] sm:$0xff]   ;;  %v4855_v52 = vld [vmem:[%s6306_s3 + $0x250] sm:$0xff]   ;;  %v4861_v58 = vld [vmem:[%s6306_s3 + $0x2d8] sm:$0xff]  }
 0x125   : > { %v667_v62 = vmax.f32 %v653_v43, %v655_v54  ;;  %3115 = vmatmul.mubr.bf16.vlgmr.msra.gmra.mrb[8].mxu0 %v741_v55  ;;  %v746_v63 = vpack.c.bf16 %v682_v56, %v682_v56  ;;  %v748_v5 = vpack.c.bf16 %v686_v57, %v686_v57  ;;  %v685_v40 = vrot.slane %v5404_v41, 3  ;;  %v4854_v53 = vld [vmem:[%s6306_s3 + $0x288] sm:$0xff]   ;;  %v4857_v54 = vld [vmem:[%s6306_s3 + $0x2d0] sm:$0xff]   ;;  %v4859_v56 = vld [vmem:[%s6306_s3 + $0x258] sm:$0xff]  }
 0x126   : > { %v668_v2 = vmax.f32 %v654_v34, %v656_v47  ;;  %4356 = vmatpush3.bf16.msra.mxu0 %v4816_v51  ;;  %3154 = vmatprep.mubr.bf16.mxu1 %v744_v59  ;;  %v694_v43 = vrot.slane %v5406_v25, 5  ;;  %v745_v44 = vpack.c.bf16 %v681_v38, %v681_v38  ;;  %v750_v34 = vpack.c.bf16 %v690_v26, %v690_v26  ;;  %v4852_v51 = vld [vmem:[%s6306_s3 + $0x208] sm:$0xff]   ;;  %v4856_v55 = vld [vmem:[%s6306_s3 + $0x210] sm:$0xff]   ;;  %v4860_v47 = vld [vmem:[%s6306_s3 + $0x218] sm:$0xff]  }
 0x127   : > { %v5437_v4 = vmax.f32 %v661_v10, %v667_v62  ;;  %3194 = vmatprep.mubr.bf16.mxu0 %v746_v63  ;;  %3155 = vmatmul.mubr.bf16.vlgmr.msra.gmra.mrb[24].mxu1 %v743_v0  ;;  %v4824_v10 = vld [vmem:[%s6306_s3 + $0x110] sm:$0xff]   ;;  %v747_v48 = vpack.c.bf16 %v685_v40, %v685_v40  ;;  %v4863_v59 = vld [vmem:[%s6306_s3 + $0x260] sm:$0xff]   ;;  %v4867_v63 = vld [vmem:[%s6306_s3 + $0x268] sm:$0xff]  }
 0x128   : > { %v5443_v7 = vmax.f32 %v5400_v12, %v668_v2  ;;  %4378 = vmatpush3.bf16.msra.mxu1 %v4818_v60  ;;  %4357 = vmatprep.subr.bf16.mxu0 %v4819_v61  ;;  %v4826_v12 = vld [vmem:[%s6306_s3 + $0x190] sm:$0xff]   ;;  %v752_v50 = vpack.c.bf16 %v694_v43, %v694_v43  ;;  %v4862_v60 = vld [vmem:[%s6306_s3 + $0x298] sm:$0xff]   ;;  %v4865_v61 = vld [vmem:[%s6306_s3 + $0x2e0] sm:$0xff]  }
 0x129   : > { %3234 = vmatprep.mubr.bf16.mxu1 %v748_v5  ;;  %4379 = vmatprep.subr.bf16.mxu1 %v4821_v1  ;;  %v4858_v57 = vld [vmem:[%s6306_s3 + $0x290] sm:$0xff]   ;;  %v4864_v62 = vld [vmem:[%s6306_s3 + $0x220] sm:$0xff]   ;;  %v4869_v1 = vld [vmem:[%s6306_s3 + $0x2e8] sm:$0xff]  }
 0x12a   : > { %4358 = vmatpush3.bf16.msra.mxu0 %v4820_v3  ;;  %v4866_v0 = vld [vmem:[%s6306_s3 + $0x2a0] sm:$0xff]   ;;  %v4868_v2 = vld [vmem:[%s6306_s3 + $0x228] sm:$0xff]   ;;  %v4871_v3 = vld [vmem:[%s6306_s3 + $0x270] sm:$0xff]  }
 0x12b   : > { %4359 = vmatprep.subr.bf16.mxu0 %v4823_v6  ;;  %v4870_v5 = vld [vmem:[%s6306_s3 + $0x2a8] sm:$0xff]   ;;  %v4873_v6 = vld [vmem:[%s6306_s3 + $0x2f0] sm:$0xff]   ;;  %v4893_v26 = vld [vmem:[%s6306_s3 + $0x3d8] sm:$0xff]  }
 0x12c   : > { %4380 = vmatpush3.bf16.msra.mxu1 %v4822_v8  ;;  %v4872_v8 = vld [vmem:[%s6306_s3 + $0x230] sm:$0xff]   ;;  %v4892_v40 = vld [vmem:[%s6306_s3 + $0x318] sm:$0xff]   ;;  %v4897_v43 = vld [vmem:[%s6306_s3 + $0x3e0] sm:$0xff]  }
 0x12d   : > { %4381 = vmatprep.subr.bf16.mxu1 %v4825_v9  ;;  %v4875_v9 = vld [vmem:[%s6306_s3 + $0x278] sm:$0xff]   ;;  %v4888_v38 = vld [vmem:[%s6306_s3 + $0x310] sm:$0xff]  }
 0x12e   : > { %4360 = vmatpush3.bf16.msra.mxu0 %v4824_v10  ;;  %v4874_v10 = vld [vmem:[%s6306_s3 + $0x2b0] sm:$0xff]  }
 0x12f   : > { %4361 = vmatprep.subr.bf16.mxu0 %v4827_v11  ;;  %v4877_v11 = vld [vmem:[%s6306_s3 + $0x2f8] sm:$0xff]  }
 0x130   : > { %4382 = vmatpush3.bf16.msra.mxu1 %v4826_v12  ;;  %v4876_v12 = vld [vmem:[%s6306_s3 + $0x238] sm:$0xff]  }
 0x131   : > { %4383 = vmatprep.subr.bf16.mxu1 %v4829_v13  ;;  %v689_v13 = vrot.slane %v5404_v41, 4 }
 0x132   : > { %4362 = vmatpush3.bf16.msra.mxu0 %v4828_v14  ;;  %v4879_v14 = vld [vmem:[%s6306_s3 + $0x340] sm:$0xff]  }
 0x133   : > { %4363 = vmatprep.subr.bf16.mxu0 %v4831_v15  ;;  %v4878_v15 = vld [vmem:[%s6306_s3 + $0x2b8] sm:$0xff]  }
 0x134   : > { %4384 = vmatpush3.bf16.msra.mxu1 %v4830_v16  ;;  %v698_v16 = vrot.slane %v5406_v25, 6 }
 0x135   : > { %4385 = vmatprep.subr.bf16.mxu1 %v4833_v17  ;;  %v693_v17 = vrot.slane %v5404_v41, 5 }
 0x136   : > { %4364 = vmatpush3.bf16.msra.mxu0 %v4832_v18  ;;  %v4881_v18 = vld [vmem:[%s6306_s3 + $0x3c0] sm:$0xff]  }
 0x137   : > { %4365 = vmatprep.subr.bf16.mxu0 %v4835_v19  ;;  %v4880_v19 = vld [vmem:[%s6306_s3 + $0x300] sm:$0xff]  }
 0x138   : > { %4386 = vmatpush3.bf16.msra.mxu1 %v4834_v20  ;;  %v702_v20 = vrot.slane %v5406_v25, 7 }
 0x139   : > { %4387 = vmatprep.subr.bf16.mxu1 %v4837_v21  ;;  %v749_v21 = vpack.c.bf16 %v689_v13, %v689_v13  ;;  %v4922_v13 = vld [vmem:[%s6306_s3 + $0x490] sm:$0xff]  }
 0x13a   : > { %4366 = vmatpush3.bf16.msra.mxu0 %v4836_v22  ;;  %v4883_v22 = vld [vmem:[%s6306_s3 + $0x348] sm:$0xff]   ;;  %v756_v25 = vpack.c.bf16 %v702_v20, %v702_v20 }
 0x13b   : > { %4367 = vmatprep.subr.bf16.mxu0 %v4839_v27  ;;  %v754_v27 = vpack.c.bf16 %v698_v16, %v698_v16  ;;  %v4927_v16 = vld [vmem:[%s6306_s3 + $0x460] sm:$0xff]   ;;  %v4931_v20 = vld [vmem:[%s6306_s3 + $0x468] sm:$0xff]  }
 0x13c   : > { %4388 = vmatpush3.bf16.msra.mxu1 %v4838_v29  ;;  %v4882_v29 = vld [vmem:[%s6306_s3 + $0x380] sm:$0xff]  }
 0x13d   : > { %4389 = vmatprep.subr.bf16.mxu1 %v4841_v30  ;;  %v751_v30 = vpack.c.bf16 %v693_v17, %v693_v17  ;;  %v4926_v17 = vld [vmem:[%s6306_s3 + $0x498] sm:$0xff]  }
 0x13e   : > { %4368 = vmatpush3.bf16.msra.mxu0 %v4840_v31  ;;  %v4885_v31 = vld [vmem:[%s6306_s3 + $0x3c8] sm:$0xff]  }
 0x13f   : > { %4369 = vmatprep.subr.bf16.mxu0 %v4843_v33  ;;  %v4884_v33 = vld [vmem:[%s6306_s3 + $0x308] sm:$0xff]  }
 0x140   : > { %4390 = vmatpush3.bf16.msra.mxu1 %v4842_v36  ;;  %v4887_v36 = vld [vmem:[%s6306_s3 + $0x350] sm:$0xff]  }
 0x141   : > { %4391 = vmatprep.subr.bf16.mxu1 %v4845_v23  ;;  %v4886_v23 = vld [vmem:[%s6306_s3 + $0x388] sm:$0xff]  }
 0x142   : > { %4370 = vmatpush3.bf16.msra.mxu0 %v4844_v37  ;;  %v4889_v37 = vld [vmem:[%s6306_s3 + $0x3d0] sm:$0xff]  }
 0x143   : > { %4399 = vmatprep.subr.bf16.mxu0 %v4847_v24  ;;  %v4891_v24 = vld [vmem:[%s6306_s3 + $0x358] sm:$0xff]  }
 0x144   : > { %4392 = vmatpush3.bf16.msra.mxu1 %v4846_v39  ;;  %v4890_v39 = vld [vmem:[%s6306_s3 + $0x390] sm:$0xff]  }
 0x145   : > { %3195 = vmatmul.mubr.bf16.vlgmr.msra.gmra.mrb[12].mxu0 %v745_v44  ;;  %4421 = vmatprep.subr.bf16.mxu1 %v4849_v28  ;;  %v4895_v28 = vld [vmem:[%s6306_s3 + $0x360] sm:$0xff]  }
 0x146   : > { %4400 = vmatpush3.bf16.msra.mxu0 %v4848_v42  ;;  %3274 = vmatprep.mubr.bf16.mxu0 %v750_v34  ;;  %v4894_v42 = vld [vmem:[%s6306_s3 + $0x398] sm:$0xff]   ;;  %v4896_v44 = vld [vmem:[%s6306_s3 + $0x320] sm:$0xff]  }
 0x147   : > { %3235 = vmatmul.mubr.bf16.vlgmr.msra.gmra.mrb[28].mxu1 %v747_v48  ;;  %4401 = vmatprep.subr.bf16.mxu0 %v4851_v32  ;;  %v4899_v32 = vld [vmem:[%s6306_s3 + $0x368] sm:$0xff]   ;;  %v4898_v34 = vld [vmem:[%s6306_s3 + $0x3a0] sm:$0xff]  }
 0x148   : > { %4422 = vmatpush3.bf16.msra.mxu1 %v4850_v46  ;;  %3314 = vmatprep.mubr.bf16.mxu1 %v752_v50  ;;  %v4901_v46 = vld [vmem:[%s6306_s3 + $0x3e8] sm:$0xff]  }
 0x149   : > { %4423 = vmatprep.subr.bf16.mxu1 %v4853_v49  ;;  %v4900_v48 = vld [vmem:[%s6306_s3 + $0x328] sm:$0xff]   ;;  %v4903_v49 = vld [vmem:[%s6306_s3 + $0x370] sm:$0xff]  }
 0x14a   : > { %4402 = vmatpush3.bf16.msra.mxu0 %v4852_v51  ;;  %v4902_v50 = vld [vmem:[%s6306_s3 + $0x3a8] sm:$0xff]   ;;  %v4905_v51 = vld [vmem:[%s6306_s3 + $0x3f0] sm:$0xff]  }
 0x14b   : > { %4403 = vmatprep.subr.bf16.mxu0 %v4855_v52  ;;  %v4904_v52 = vld [vmem:[%s6306_s3 + $0x330] sm:$0xff]  }
 0x14c   : > { %4424 = vmatpush3.bf16.msra.mxu1 %v4854_v53  ;;  %v4907_v53 = vld [vmem:[%s6306_s3 + $0x378] sm:$0xff]  }
 0x14d   : > { %4425 = vmatprep.subr.bf16.mxu1 %v4857_v54  ;;  %v4906_v54 = vld [vmem:[%s6306_s3 + $0x3b0] sm:$0xff]  }
 0x14e   : > { %4404 = vmatpush3.bf16.msra.mxu0 %v4856_v55  ;;  %v4909_v55 = vld [vmem:[%s6306_s3 + $0x3f8] sm:$0xff]  }
 0x14f   : > { %4405 = vmatprep.subr.bf16.mxu0 %v4859_v56  ;;  %v4908_v56 = vld [vmem:[%s6306_s3 + $0x338] sm:$0xff]  }
 0x150   : > { %4426 = vmatpush3.bf16.msra.mxu1 %v4858_v57  ;;  %v697_v57 = vrot.slane %v5404_v41, 6 }
 0x151   : > { %4427 = vmatprep.subr.bf16.mxu1 %v4861_v58  ;;  %v4911_v58 = vld [vmem:[%s6306_s3 + $0x440] sm:$0xff]  }
 0x152   : > { %4406 = vmatpush3.bf16.msra.mxu0 %v4860_v47  ;;  %v4910_v47 = vld [vmem:[%s6306_s3 + $0x3b8] sm:$0xff]  }
 0x153   : > { %4407 = vmatprep.subr.bf16.mxu0 %v4863_v59  ;;  %v701_v59 = vrot.slane %v5404_v41, 7  ;;  %v758_v41 = vpack.c.bf16 %v5412_v35, %v5412_v35 }
 0x154   : > { %4428 = vmatpush3.bf16.msra.mxu1 %v4862_v60  ;;  %v4913_v60 = vld [vmem:[%s6306_s3 + $0x4c0] sm:$0xff]  }
 0x155   : > { %4429 = vmatprep.subr.bf16.mxu1 %v4865_v61  ;;  %v4912_v61 = vld [vmem:[%s6306_s3 + $0x400] sm:$0xff]  }
 0x156   : > { %4408 = vmatpush3.bf16.msra.mxu0 %v4864_v62  ;;  %v708_v62 = vrot.slane %v5412_v35, 1 }
 0x157   : > { %4409 = vmatprep.subr.bf16.mxu0 %v4867_v63  ;;  %v753_v63 = vpack.c.bf16 %v697_v57, %v697_v57  ;;  %v4957_v57 = vld [vmem:[%s6306_s3 + $0x5d8] sm:$0xff]  }
 0x158   : > { %4430 = vmatpush3.bf16.msra.mxu1 %v4866_v0  ;;  %v4915_v0 = vld [vmem:[%s6306_s3 + $0x448] sm:$0xff]  }
 0x159   : > { %4431 = vmatprep.subr.bf16.mxu1 %v4869_v1  ;;  %v4914_v1 = vld [vmem:[%s6306_s3 + $0x480] sm:$0xff]  }
 0x15a   : > { %4410 = vmatpush3.bf16.msra.mxu0 %v4868_v2  ;;  %v755_v2 = vpack.c.bf16 %v701_v59, %v701_v59  ;;  %v4958_v59 = vld [vmem:[%s6306_s3 + $0x598] sm:$0xff]  }
 0x15b   : > { %4411 = vmatprep.subr.bf16.mxu0 %v4871_v3  ;;  %v4917_v3 = vld [vmem:[%s6306_s3 + $0x4c8] sm:$0xff]  }
 0x15c   : > { %4432 = vmatpush3.bf16.msra.mxu1 %v4870_v5  ;;  %v760_v5 = vpack.c.bf16 %v708_v62, %v708_v62  ;;  %v4963_v62 = vld [vmem:[%s6306_s3 + $0x568] sm:$0xff]  }
 0x15d   : > { %4433 = vmatprep.subr.bf16.mxu1 %v4873_v6  ;;  %v4916_v6 = vld [vmem:[%s6306_s3 + $0x408] sm:$0xff]  }
 0x15e   : > { %4412 = vmatpush3.bf16.msra.mxu0 %v4872_v8  ;;  %v4919_v8 = vld [vmem:[%s6306_s3 + $0x450] sm:$0xff]  }
 0x15f   : > { %4413 = vmatprep.subr.bf16.mxu0 %v4875_v9  ;;  %v4918_v9 = vld [vmem:[%s6306_s3 + $0x488] sm:$0xff]  }
 0x160   : > { %4434 = vmatpush3.bf16.msra.mxu1 %v4874_v10  ;;  %v4921_v10 = vld [vmem:[%s6306_s3 + $0x4d0] sm:$0xff]  }
 0x161   : > { %4435 = vmatprep.subr.bf16.mxu1 %v4877_v11  ;;  %v4920_v11 = vld [vmem:[%s6306_s3 + $0x410] sm:$0xff]  }
 0x162   : > { %4414 = vmatpush3.bf16.msra.mxu0 %v4876_v12  ;;  %v4923_v12 = vld [vmem:[%s6306_s3 + $0x458] sm:$0xff]  }
 0x163   : > { %4443 = vmatprep.subr.bf16.mxu0 %v4879_v14  ;;  %v4925_v14 = vld [vmem:[%s6306_s3 + $0x4d8] sm:$0xff]  }
 0x164   : > { %4436 = vmatpush3.bf16.msra.mxu1 %v4878_v15  ;;  %v4924_v15 = vld [vmem:[%s6306_s3 + $0x418] sm:$0xff]  }
 0x165   : > { %3275 = vmatmul.mubr.bf16.vlgmr.msra.gmra.mrb[16].mxu0 %v749_v21  ;;  %4465 = vmatprep.subr.bf16.mxu1 %v4881_v18  ;;  %v4929_v18 = vld [vmem:[%s6306_s3 + $0x4e0] sm:$0xff]  }
 0x166   : > { %4444 = vmatpush3.bf16.msra.mxu0 %v4880_v19  ;;  %3354 = vmatprep.mubr.bf16.mxu0 %v754_v27  ;;  %v4928_v19 = vld [vmem:[%s6306_s3 + $0x420] sm:$0xff]   ;;  %v4932_v27 = vld [vmem:[%s6306_s3 + $0x428] sm:$0xff]  }
 0x167   : > { %3315 = vmatmul.mubr.bf16.vlgmr.msra.gmra.mrb[32].mxu1 %v751_v30  ;;  %4445 = vmatprep.subr.bf16.mxu0 %v4883_v22  ;;  %v4930_v21 = vld [vmem:[%s6306_s3 + $0x4a0] sm:$0xff]   ;;  %v4933_v22 = vld [vmem:[%s6306_s3 + $0x4e8] sm:$0xff]  }
 0x168   : > { %4466 = vmatpush3.bf16.msra.mxu1 %v4882_v29  ;;  %3394 = vmatprep.mubr.bf16.mxu1 %v756_v25  ;;  %v4935_v29 = vld [vmem:[%s6306_s3 + $0x470] sm:$0xff]   ;;  %v4934_v30 = vld [vmem:[%s6306_s3 + $0x4a8] sm:$0xff]  }
 0x169   : > { %4467 = vmatprep.subr.bf16.mxu1 %v4885_v31  ;;  %v4937_v31 = vld [vmem:[%s6306_s3 + $0x4f0] sm:$0xff]  }
 0x16a   : > { %4446 = vmatpush3.bf16.msra.mxu0 %v4884_v33  ;;  %v4936_v25 = vld [vmem:[%s6306_s3 + $0x430] sm:$0xff]   ;;  %v4939_v33 = vld [vmem:[%s6306_s3 + $0x478] sm:$0xff]  }
 0x16b   : > { %4447 = vmatprep.subr.bf16.mxu0 %v4887_v36  ;;  %v4938_v36 = vld [vmem:[%s6306_s3 + $0x4b0] sm:$0xff]  }
 0x16c   : > { %4468 = vmatpush3.bf16.msra.mxu1 %v4886_v23  ;;  %v4941_v23 = vld [vmem:[%s6306_s3 + $0x4f8] sm:$0xff]  }
 0x16d   : > { %4469 = vmatprep.subr.bf16.mxu1 %v4889_v37  ;;  %v4940_v37 = vld [vmem:[%s6306_s3 + $0x438] sm:$0xff]  }
 0x16e   : > { %4448 = vmatpush3.bf16.msra.mxu0 %v4888_v38  ;;  %v4943_v38 = vld [vmem:[%s6306_s3 + $0x540] sm:$0xff]  }
 0x16f   : > { %4449 = vmatprep.subr.bf16.mxu0 %v4891_v24  ;;  %v4942_v24 = vld [vmem:[%s6306_s3 + $0x4b8] sm:$0xff]  }
 0x170   : > { %4470 = vmatpush3.bf16.msra.mxu1 %v4890_v39  ;;  %v712_v39 = vrot.slane %v5412_v35, 2 }
 0x171   : > { %4471 = vmatprep.subr.bf16.mxu1 %v4893_v26  ;;  %v707_v26 = vrot.slane %v5408_v45, 1 }
 0x172   : > { %4450 = vmatpush3.bf16.msra.mxu0 %v4892_v40  ;;  %v4945_v40 = vld [vmem:[%s6306_s3 + $0x5c0] sm:$0xff]  }
 0x173   : > { %4451 = vmatprep.subr.bf16.mxu0 %v4895_v28  ;;  %v4944_v28 = vld [vmem:[%s6306_s3 + $0x500] sm:$0xff]  }
 0x174   : > { %4472 = vmatpush3.bf16.msra.mxu1 %v4894_v42  ;;  %v716_v42 = vrot.slane %v5412_v35, 3 }
 0x175   : > { %4473 = vmatprep.subr.bf16.mxu1 %v4897_v43  ;;  %v757_v43 = vpack.c.bf16 %v5408_v45, %v5408_v45 }
 0x176   : > { %4452 = vmatpush3.bf16.msra.mxu0 %v4896_v44  ;;  %v4947_v44 = vld [vmem:[%s6306_s3 + $0x548] sm:$0xff]  }
 0x177   : > { %4453 = vmatprep.subr.bf16.mxu0 %v4899_v32  ;;  %v762_v32 = vpack.c.bf16 %v712_v39, %v712_v39  ;;  %v4988_v39 = vld [vmem:[%s6306_s3 + $0x618] sm:$0xff]  }
 0x178   : > { %4474 = vmatpush3.bf16.msra.mxu1 %v4898_v34  ;;  %v4946_v34 = vld [vmem:[%s6306_s3 + $0x580] sm:$0xff]  }
 0x179   : > { %4475 = vmatprep.subr.bf16.mxu1 %v4901_v46  ;;  %v759_v46 = vpack.c.bf16 %v707_v26, %v707_v26  ;;  %v4991_v26 = vld [vmem:[%s6306_s3 + $0x660] sm:$0xff]  }
 0x17a   : > { %4454 = vmatpush3.bf16.msra.mxu0 %v4900_v48  ;;  %v4949_v48 = vld [vmem:[%s6306_s3 + $0x5c8] sm:$0xff]  }
 0x17b   : > { %4455 = vmatprep.subr.bf16.mxu0 %v4903_v49  ;;  %v764_v49 = vpack.c.bf16 %v716_v42, %v716_v42  ;;  %v4992_v42 = vld [vmem:[%s6306_s3 + $0x620] sm:$0xff]  }
 0x17c   : > { %4476 = vmatpush3.bf16.msra.mxu1 %v4902_v50  ;;  %v4948_v50 = vld [vmem:[%s6306_s3 + $0x508] sm:$0xff]  }
 0x17d   : > { %4477 = vmatprep.subr.bf16.mxu1 %v4905_v51  ;;  %v4951_v51 = vld [vmem:[%s6306_s3 + $0x550] sm:$0xff]  }
 0x17e   : > { %4456 = vmatpush3.bf16.msra.mxu0 %v4904_v52  ;;  %v4950_v52 = vld [vmem:[%s6306_s3 + $0x588] sm:$0xff]  }
 0x17f   : > { %4457 = vmatprep.subr.bf16.mxu0 %v4907_v53  ;;  %v4953_v53 = vld [vmem:[%s6306_s3 + $0x5d0] sm:$0xff]  }
 0x180   : > { %4478 = vmatpush3.bf16.msra.mxu1 %v4906_v54  ;;  %v4952_v54 = vld [vmem:[%s6306_s3 + $0x510] sm:$0xff]  }
 0x181   : > { %4479 = vmatprep.subr.bf16.mxu1 %v4909_v55  ;;  %v4955_v55 = vld [vmem:[%s6306_s3 + $0x558] sm:$0xff]  }
 0x182   : > { %4458 = vmatpush3.bf16.msra.mxu0 %v4908_v56  ;;  %v4954_v56 = vld [vmem:[%s6306_s3 + $0x590] sm:$0xff]  }
 0x183   : > { %4487 = vmatprep.subr.bf16.mxu0 %v4911_v58  ;;  %v4956_v58 = vld [vmem:[%s6306_s3 + $0x518] sm:$0xff]  }
 0x184   : > { %4480 = vmatpush3.bf16.msra.mxu1 %v4910_v47  ;;  %v4959_v47 = vld [vmem:[%s6306_s3 + $0x560] sm:$0xff]  }
 0x185   : > { %3355 = vmatmul.mubr.bf16.vlgmr.msra.gmra.mrb[20].mxu0 %v753_v63  ;;  %4509 = vmatprep.subr.bf16.mxu1 %v4913_v60  ;;  %v4961_v60 = vld [vmem:[%s6306_s3 + $0x5e0] sm:$0xff]  }
 0x186   : > { %4488 = vmatpush3.bf16.msra.mxu0 %v4912_v61  ;;  %3434 = vmatprep.mubr.bf16.mxu0 %v758_v41  ;;  %v4960_v61 = vld [vmem:[%s6306_s3 + $0x520] sm:$0xff]   ;;  %v4964_v41 = vld [vmem:[%s6306_s3 + $0x528] sm:$0xff]  }
 0x187   : > { %3395 = vmatmul.mubr.bf16.vlgmr.msra.gmra.mrb[36].mxu1 %v755_v2  ;;  %4489 = vmatprep.subr.bf16.mxu0 %v4915_v0  ;;  %v4962_v63 = vld [vmem:[%s6306_s3 + $0x5a0] sm:$0xff]   ;;  %v4965_v0 = vld [vmem:[%s6306_s3 + $0x5e8] sm:$0xff]  }
 0x188   : > { %4510 = vmatpush3.bf16.msra.mxu1 %v4914_v1  ;;  %3474 = vmatprep.mubr.bf16.mxu1 %v760_v5  ;;  %v4967_v1 = vld [vmem:[%s6306_s3 + $0x570] sm:$0xff]   ;;  %v4966_v2 = vld [vmem:[%s6306_s3 + $0x5a8] sm:$0xff]  }
 0x189   : > { %4511 = vmatprep.subr.bf16.mxu1 %v4917_v3  ;;  %v4969_v3 = vld [vmem:[%s6306_s3 + $0x5f0] sm:$0xff]  }
 0x18a   : > { %4490 = vmatpush3.bf16.msra.mxu0 %v4916_v6  ;;  %v4968_v5 = vld [vmem:[%s6306_s3 + $0x530] sm:$0xff]   ;;  %v4971_v6 = vld [vmem:[%s6306_s3 + $0x578] sm:$0xff]  }
 0x18b   : > { %4491 = vmatprep.subr.bf16.mxu0 %v4919_v8  ;;  %v4970_v8 = vld [vmem:[%s6306_s3 + $0x5b0] sm:$0xff]  }
 0x18c   : > { %4512 = vmatpush3.bf16.msra.mxu1 %v4918_v9  ;;  %v4973_v9 = vld [vmem:[%s6306_s3 + $0x5f8] sm:$0xff]  }
 0x18d   : > { %4513 = vmatprep.subr.bf16.mxu1 %v4921_v10  ;;  %v4972_v10 = vld [vmem:[%s6306_s3 + $0x538] sm:$0xff]  }
 0x18e   : > { %4492 = vmatpush3.bf16.msra.mxu0 %v4920_v11  ;;  %v711_v11 = vrot.slane %v5408_v45, 2 }
 0x18f   : > { %4493 = vmatprep.subr.bf16.mxu0 %v4923_v12  ;;  %v4975_v12 = vld [vmem:[%s6306_s3 + $0x640] sm:$0xff]  }
 0x190   : > { %4514 = vmatpush3.bf16.msra.mxu1 %v4922_v13  ;;  %v4974_v13 = vld [vmem:[%s6306_s3 + $0x5b8] sm:$0xff]  }
 0x191   : > { %4515 = vmatprep.subr.bf16.mxu1 %v4925_v14  ;;  %v720_v14 = vrot.slane %v5412_v35, 4 }
 0x192   : > { %4494 = vmatpush3.bf16.msra.mxu0 %v4924_v15  ;;  %v715_v15 = vrot.slane %v5408_v45, 3 }
 0x193   : > { %4495 = vmatprep.subr.bf16.mxu0 %v4927_v16  ;;  %v4977_v16 = vld [vmem:[%s6306_s3 + $0x6c0] sm:$0xff]  }
 0x194   : > { %4516 = vmatpush3.bf16.msra.mxu1 %v4926_v17  ;;  %v4976_v17 = vld [vmem:[%s6306_s3 + $0x600] sm:$0xff]  }
 0x195   : > { %4517 = vmatprep.subr.bf16.mxu1 %v4929_v18  ;;  %v724_v18 = vrot.slane %v5412_v35, 5 }
 0x196   : > { %4496 = vmatpush3.bf16.msra.mxu0 %v4928_v19  ;;  %v761_v19 = vpack.c.bf16 %v711_v11, %v711_v11  ;;  %v5018_v11 = vld [vmem:[%s6306_s3 + $0x790] sm:$0xff]  }
 0x197   : > { %4497 = vmatprep.subr.bf16.mxu0 %v4931_v20  ;;  %v4979_v20 = vld [vmem:[%s6306_s3 + $0x648] sm:$0xff]  }
 0x198   : > { %4518 = vmatpush3.bf16.msra.mxu1 %v4930_v21  ;;  %v766_v21 = vpack.c.bf16 %v720_v14, %v720_v14  ;;  %v5023_v14 = vld [vmem:[%s6306_s3 + $0x760] sm:$0xff]  }
 0x199   : > { %4519 = vmatprep.subr.bf16.mxu1 %v4933_v22  ;;  %v4978_v22 = vld [vmem:[%s6306_s3 + $0x680] sm:$0xff]  }
 0x19a   : > { %4498 = vmatpush3.bf16.msra.mxu0 %v4932_v27  ;;  %v763_v27 = vpack.c.bf16 %v715_v15, %v715_v15  ;;  %v5022_v15 = vld [vmem:[%s6306_s3 + $0x798] sm:$0xff]  }
 0x19b   : > { %4499 = vmatprep.subr.bf16.mxu0 %v4935_v29  ;;  %v4981_v29 = vld [vmem:[%s6306_s3 + $0x6c8] sm:$0xff]  }
 0x19c   : > { %4520 = vmatpush3.bf16.msra.mxu1 %v4934_v30  ;;  %v768_v30 = vpack.c.bf16 %v724_v18, %v724_v18  ;;  %v5027_v18 = vld [vmem:[%s6306_s3 + $0x768] sm:$0xff]  }
 0x19d   : > { %4521 = vmatprep.subr.bf16.mxu1 %v4937_v31  ;;  %v4980_v31 = vld [vmem:[%s6306_s3 + $0x608] sm:$0xff]  }
 0x19e   : > { %4500 = vmatpush3.bf16.msra.mxu0 %v4936_v25  ;;  %v4983_v25 = vld [vmem:[%s6306_s3 + $0x650] sm:$0xff]  }
 0x19f   : > { %4501 = vmatprep.subr.bf16.mxu0 %v4939_v33  ;;  %v4982_v33 = vld [vmem:[%s6306_s3 + $0x688] sm:$0xff]  }
 0x1a0   : > { %4522 = vmatpush3.bf16.msra.mxu1 %v4938_v36  ;;  %v4985_v36 = vld [vmem:[%s6306_s3 + $0x6d0] sm:$0xff]  }
 0x1a1   : > { %4523 = vmatprep.subr.bf16.mxu1 %v4941_v23  ;;  %v4984_v23 = vld [vmem:[%s6306_s3 + $0x610] sm:$0xff]  }
 0x1a2   : > { %4502 = vmatpush3.bf16.msra.mxu0 %v4940_v37  ;;  %v4987_v37 = vld [vmem:[%s6306_s3 + $0x658] sm:$0xff]  }
 0x1a3   : > { %4531 = vmatprep.subr.bf16.mxu0 %v4943_v38  ;;  %v4986_v38 = vld [vmem:[%s6306_s3 + $0x690] sm:$0xff]  }
 0x1a4   : > { %4524 = vmatpush3.bf16.msra.mxu1 %v4942_v24  ;;  %v4989_v24 = vld [vmem:[%s6306_s3 + $0x6d8] sm:$0xff]  }
 0x1a5   : > { %3435 = vmatmul.mubr.bf16.vlgmr.msra.gmra.mrb[24].mxu0 %v757_v43  ;;  %4553 = vmatprep.subr.bf16.mxu1 %v4945_v40  ;;  %v4990_v40 = vld [vmem:[%s6306_s3 + $0x698] sm:$0xff]   ;;  %v4995_v43 = vld [vmem:[%s6306_s3 + $0x668] sm:$0xff]  }
 0x1a6   : > { %4532 = vmatpush3.bf16.msra.mxu0 %v4944_v28  ;;  %3514 = vmatprep.mubr.bf16.mxu0 %v762_v32  ;;  %v4993_v28 = vld [vmem:[%s6306_s3 + $0x6e0] sm:$0xff]   ;;  %v4997_v32 = vld [vmem:[%s6306_s3 + $0x6e8] sm:$0xff]  }
 0x1a7   : > { %3475 = vmatmul.mubr.bf16.vlgmr.msra.gmra.mrb[40].mxu1 %v759_v46  ;;  %4533 = vmatprep.subr.bf16.mxu0 %v4947_v44  ;;  %v4994_v44 = vld [vmem:[%s6306_s3 + $0x6a0] sm:$0xff]   ;;  %v4999_v46 = vld [vmem:[%s6306_s3 + $0x670] sm:$0xff]  }
 0x1a8   : > { %4554 = vmatpush3.bf16.msra.mxu1 %v4946_v34  ;;  %3554 = vmatprep.mubr.bf16.mxu1 %v764_v49  ;;  %v4996_v34 = vld [vmem:[%s6306_s3 + $0x628] sm:$0xff]   ;;  %v5001_v49 = vld [vmem:[%s6306_s3 + $0x6f0] sm:$0xff]  }
 0x1a9   : > { %4555 = vmatprep.subr.bf16.mxu1 %v4949_v48  ;;  %v4998_v48 = vld [vmem:[%s6306_s3 + $0x6a8] sm:$0xff]  }
 0x1aa   : > { %4534 = vmatpush3.bf16.msra.mxu0 %v4948_v50  ;;  %v5000_v50 = vld [vmem:[%s6306_s3 + $0x630] sm:$0xff]  }
 0x1ab   : > { %4535 = vmatprep.subr.bf16.mxu0 %v4951_v51  ;;  %v5003_v51 = vld [vmem:[%s6306_s3 + $0x678] sm:$0xff]  }
 0x1ac   : > { %4556 = vmatpush3.bf16.msra.mxu1 %v4950_v52  ;;  %v5002_v52 = vld [vmem:[%s6306_s3 + $0x6b0] sm:$0xff]  }
 0x1ad   : > { %4557 = vmatprep.subr.bf16.mxu1 %v4953_v53  ;;  %v5005_v53 = vld [vmem:[%s6306_s3 + $0x6f8] sm:$0xff]  }
 0x1ae   : > { %4536 = vmatpush3.bf16.msra.mxu0 %v4952_v54  ;;  %v5004_v54 = vld [vmem:[%s6306_s3 + $0x638] sm:$0xff]  }
 0x1af   : > { %4537 = vmatprep.subr.bf16.mxu0 %v4955_v55  ;;  %v719_v55 = vrot.slane %v5408_v45, 4 }
 0x1b0   : > { %4558 = vmatpush3.bf16.msra.mxu1 %v4954_v56  ;;  %v5007_v56 = vld [vmem:[%s6306_s3 + $0x740] sm:$0xff]  }
 0x1b1   : > { %4559 = vmatprep.subr.bf16.mxu1 %v4957_v57  ;;  %v5006_v57 = vld [vmem:[%s6306_s3 + $0x6b8] sm:$0xff]  }
 0x1b2   : > { %4538 = vmatpush3.bf16.msra.mxu0 %v4956_v58  ;;  %v728_v58 = vrot.slane %v5412_v35, 6 }
 0x1b3   : > { %4539 = vmatprep.subr.bf16.mxu0 %v4959_v47  ;;  %v723_v47 = vrot.slane %v5408_v45, 5 }
 0x1b4   : > { %4560 = vmatpush3.bf16.msra.mxu1 %v4958_v59  ;;  %v5009_v59 = vld [vmem:[%s6306_s3 + $0x7c0] sm:$0xff]  }
 0x1b5   : > { %4561 = vmatprep.subr.bf16.mxu1 %v4961_v60  ;;  %v5008_v60 = vld [vmem:[%s6306_s3 + $0x700] sm:$0xff]  }
 0x1b6   : > { %4540 = vmatpush3.bf16.msra.mxu0 %v4960_v61  ;;  %v732_v61 = vrot.slane %v5412_v35, 7 }
 0x1b7   : > { %4541 = vmatprep.subr.bf16.mxu0 %v4963_v62  ;;  %v765_v62 = vpack.c.bf16 %v719_v55, %v719_v55  ;;  %v5043_v55 = vld [vmem:[%s6306_s3 + $0x848] sm:$0xff]  }
 0x1b8   : > { %4562 = vmatpush3.bf16.msra.mxu1 %v4962_v63  ;;  %v5011_v63 = vld [vmem:[%s6306_s3 + $0x748] sm:$0xff]   ;;  %v772_v35 = vpack.c.bf16 %v732_v61, %v732_v61  ;;  %v5049_v61 = vld [vmem:[%s6306_s3 + $0x8d0] sm:$0xff]  }
 0x1b9   : > { %4563 = vmatprep.subr.bf16.mxu1 %v4965_v0  ;;  %v770_v0 = vpack.c.bf16 %v728_v58, %v728_v58  ;;  %v5045_v58 = vld [vmem:[%s6306_s3 + $0x8c8] sm:$0xff]  }
 0x1ba   : > { %4542 = vmatpush3.bf16.msra.mxu0 %v4964_v41  ;;  %v5010_v41 = vld [vmem:[%s6306_s3 + $0x780] sm:$0xff]  }
 0x1bb   : > { %4543 = vmatprep.subr.bf16.mxu0 %v4967_v1  ;;  %v767_v1 = vpack.c.bf16 %v723_v47, %v723_v47 }
 0x1bc   : > { %4564 = vmatpush3.bf16.msra.mxu1 %v4966_v2  ;;  %v5013_v2 = vld [vmem:[%s6306_s3 + $0x7c8] sm:$0xff]  }
 0x1bd   : > { %4565 = vmatprep.subr.bf16.mxu1 %v4969_v3  ;;  %v5012_v3 = vld [vmem:[%s6306_s3 + $0x708] sm:$0xff]  }
 0x1be   : > { %4544 = vmatpush3.bf16.msra.mxu0 %v4968_v5  ;;  %v5015_v5 = vld [vmem:[%s6306_s3 + $0x750] sm:$0xff]  }
 0x1bf   : > { %4545 = vmatprep.subr.bf16.mxu0 %v4971_v6  ;;  %v5014_v6 = vld [vmem:[%s6306_s3 + $0x788] sm:$0xff]  }
 0x1c0   : > { %4566 = vmatpush3.bf16.msra.mxu1 %v4970_v8  ;;  %v5017_v8 = vld [vmem:[%s6306_s3 + $0x7d0] sm:$0xff]  }
 0x1c1   : > { %4567 = vmatprep.subr.bf16.mxu1 %v4973_v9  ;;  %v5016_v9 = vld [vmem:[%s6306_s3 + $0x710] sm:$0xff]  }
 0x1c2   : > { %4546 = vmatpush3.bf16.msra.mxu0 %v4972_v10  ;;  %v5019_v10 = vld [vmem:[%s6306_s3 + $0x758] sm:$0xff]  }
 0x1c3   : > { %4575 = vmatprep.subr.bf16.mxu0 %v4975_v12  ;;  %v5021_v12 = vld [vmem:[%s6306_s3 + $0x7d8] sm:$0xff]  }
 0x1c4   : > { %4568 = vmatpush3.bf16.msra.mxu1 %v4974_v13  ;;  %v5020_v13 = vld [vmem:[%s6306_s3 + $0x718] sm:$0xff]  }
 0x1c5   : > { %3515 = vmatmul.mubr.bf16.vlgmr.msra.gmra.mrb[28].mxu0 %v761_v19  ;;  %4597 = vmatprep.subr.bf16.mxu1 %v4977_v16  ;;  %v5025_v16 = vld [vmem:[%s6306_s3 + $0x7e0] sm:$0xff]  }
 0x1c6   : > { %4576 = vmatpush3.bf16.msra.mxu0 %v4976_v17  ;;  %3594 = vmatprep.mubr.bf16.mxu0 %v766_v21  ;;  %v5024_v17 = vld [vmem:[%s6306_s3 + $0x720] sm:$0xff]   ;;  %v5028_v21 = vld [vmem:[%s6306_s3 + $0x728] sm:$0xff]  }
 0x1c7   : > { %3555 = vmatmul.mubr.bf16.vlgmr.msra.gmra.mrb[44].mxu1 %v763_v27  ;;  %4577 = vmatprep.subr.bf16.mxu0 %v4979_v20  ;;  %v5026_v19 = vld [vmem:[%s6306_s3 + $0x7a0] sm:$0xff]   ;;  %v5029_v20 = vld [vmem:[%s6306_s3 + $0x7e8] sm:$0xff]  }
 0x1c8   : > { %4598 = vmatpush3.bf16.msra.mxu1 %v4978_v22  ;;  %3634 = vmatprep.mubr.bf16.mxu1 %v768_v30  ;;  %v5031_v22 = vld [vmem:[%s6306_s3 + $0x770] sm:$0xff]   ;;  %v1353_v30 = vld [vmem:[%s6307_s4] sm:$0x1] }
 0x1c9   : > { %4599 = vmatprep.subr.bf16.mxu1 %v4981_v29  ;;  %v5030_v29 = vld [vmem:[%s6306_s3 + $0x7a8] sm:$0xff]  }
 0x1ca   : > { %4578 = vmatpush3.bf16.msra.mxu0 %v4980_v31 }
 0x1cb   : > { %4579 = vmatprep.subr.bf16.mxu0 %v4983_v25  ;;  %v5033_v25 = vld [vmem:[%s6306_s3 + $0x7f0] sm:$0xff]  }
 0x1cc   : > { %4600 = vmatpush3.bf16.msra.mxu1 %v4982_v33 }
 0x1cd   : > { %4601 = vmatprep.subr.bf16.mxu1 %v4985_v36 }
 0x1ce   : > { %4580 = vmatpush3.bf16.msra.mxu0 %v4984_v23 }
 0x1cf   : > { %4581 = vmatprep.subr.bf16.mxu0 %v4987_v37  ;;  %v5032_v37 = vld [vmem:[%s6306_s3 + $0x730] sm:$0xff]  }
 0x1d0   : > { %4602 = vmatpush3.bf16.msra.mxu1 %v4986_v38 }
 0x1d1   : > { %4603 = vmatprep.subr.bf16.mxu1 %v4989_v24 }
 0x1d2   : > { %4582 = vmatpush3.bf16.msra.mxu0 %v4988_v39  ;;  %v5035_v39 = vld [vmem:[%s6306_s3 + $0x778] sm:$0xff]  }
 0x1d3   : > { %4583 = vmatprep.subr.bf16.mxu0 %v4991_v26 }
 0x1d4   : > { %4604 = vmatpush3.bf16.msra.mxu1 %v4990_v40 }
 0x1d5   : > { %4605 = vmatprep.subr.bf16.mxu1 %v4993_v28 }
 0x1d6   : > { %4584 = vmatpush3.bf16.msra.mxu0 %v4992_v42  ;;  %v5034_v42 = vld [vmem:[%s6306_s3 + $0x7b0] sm:$0xff]  }
 0x1d7   : > { %4585 = vmatprep.subr.bf16.mxu0 %v4995_v43 }
 0x1d8   : > { %4606 = vmatpush3.bf16.msra.mxu1 %v4994_v44  ;;  %v5037_v44 = vld [vmem:[%s6306_s3 + $0x7f8] sm:$0xff]  }
 0x1d9   : > { %4607 = vmatprep.subr.bf16.mxu1 %v4997_v32 }
 0x1da   : > { %4586 = vmatpush3.bf16.msra.mxu0 %v4996_v34  ;;  %v5036_v34 = vld [vmem:[%s6306_s3 + $0x738] sm:$0xff]  }
 0x1db   : > { %4587 = vmatprep.subr.bf16.mxu0 %v4999_v46  ;;  %v727_v46 = vrot.slane %v5408_v45, 6 }
 0x1dc   : > { %4608 = vmatpush3.bf16.msra.mxu1 %v4998_v48  ;;  %v5039_v48 = vld [vmem:[%s6306_s3 + $0x840] sm:$0xff]  }
 0x1dd   : > { %4609 = vmatprep.subr.bf16.mxu1 %v5001_v49  ;;  %v5038_v49 = vld [vmem:[%s6306_s3 + $0x7b8] sm:$0xff]  }
 0x1de   : > { %4588 = vmatpush3.bf16.msra.mxu0 %v5000_v50  ;;  %v731_v50 = vrot.slane %v5408_v45, 7  ;;  %v774_v45 = vpack.c.bf16 %v5443_v7, %v5443_v7 }
 0x1df   : > { %4589 = vmatprep.subr.bf16.mxu0 %v5003_v51  ;;  %v5041_v51 = vld [vmem:[%s6306_s3 + $0x8c0] sm:$0xff]  }
 0x1e0   : > { %4610 = vmatpush3.bf16.msra.mxu1 %v5002_v52  ;;  %v5040_v52 = vld [vmem:[%s6306_s3 + $0x800] sm:$0xff]  }
 0x1e1   : > { %4611 = vmatprep.subr.bf16.mxu1 %v5005_v53  ;;  %v738_v53 = vrot.slane %v5443_v7, 1  ;;  %v5047_v7 = vld [vmem:[%s6306_s3 + $0x850] sm:$0xff]  }
 0x1e2   : > { %4590 = vmatpush3.bf16.msra.mxu0 %v5004_v54  ;;  %v769_v54 = vpack.c.bf16 %v727_v46, %v727_v46 }
 0x1e3   : > { %4619 = vmatprep.subr.bf16.mxu0 %v5007_v56  ;;  %v5042_v56 = vld [vmem:[%s6306_s3 + $0x880] sm:$0xff]   ;;  %v776_v47 = vpack.c.bf16 %v738_v53, %v738_v53 }
 0x1e4   : > { %4612 = vmatpush3.bf16.msra.mxu1 %v5006_v57  ;;  %v771_v57 = vpack.c.bf16 %v731_v50, %v731_v50 }
 0x1e5   : > { %3595 = vmatmul.mubr.bf16.vlgmr.msra.gmra.mrb[32].mxu0 %v765_v62  ;;  %4641 = vmatprep.subr.bf16.mxu1 %v5009_v59  ;;  %v5044_v59 = vld [vmem:[%s6306_s3 + $0x808] sm:$0xff]   ;;  %v5048_v62 = vld [vmem:[%s6306_s3 + $0x810] sm:$0xff]  }
 0x1e6   : > { %4620 = vmatpush3.bf16.msra.mxu0 %v5008_v60  ;;  %3674 = vmatprep.mubr.bf16.mxu0 %v770_v0  ;;  %v5046_v60 = vld [vmem:[%s6306_s3 + $0x888] sm:$0xff]   ;;  %v5050_v0 = vld [vmem:[%s6306_s3 + $0x890] sm:$0xff]  }
 0x1e7   : > { %3635 = vmatmul.mubr.bf16.vlgmr.msra.gmra.mrb[48].mxu1 %v767_v1  ;;  %4621 = vmatprep.subr.bf16.mxu0 %v5011_v63  ;;  %v5051_v63 = vld [vmem:[%s6306_s3 + $0x858] sm:$0xff]  }
 0x1e8   : > { %4642 = vmatpush3.bf16.msra.mxu1 %v5010_v41  ;;  %3714 = vmatprep.mubr.bf16.mxu1 %v772_v35  ;;  %v5053_v41 = vld [vmem:[%s6306_s3 + $0x8d8] sm:$0xff]  }
 0x1e9   : > { %4643 = vmatprep.subr.bf16.mxu1 %v5013_v2  ;;  %v5052_v1 = vld [vmem:[%s6306_s3 + $0x818] sm:$0xff]   ;;  %v5055_v2 = vld [vmem:[%s6306_s3 + $0x860] sm:$0xff]  }
 0x1ea   : > { %4622 = vmatpush3.bf16.msra.mxu0 %v5012_v3  ;;  %v5054_v35 = vld [vmem:[%s6306_s3 + $0x898] sm:$0xff]   ;;  %v5057_v3 = vld [vmem:[%s6306_s3 + $0x8e0] sm:$0xff]  }
 0x1eb   : > { %4623 = vmatprep.subr.bf16.mxu0 %v5015_v5  ;;  %v5056_v5 = vld [vmem:[%s6306_s3 + $0x820] sm:$0xff]  }
 0x1ec   : > { %4644 = vmatpush3.bf16.msra.mxu1 %v5014_v6  ;;  %v5059_v6 = vld [vmem:[%s6306_s3 + $0x868] sm:$0xff]  }
 0x1ed   : > { %4645 = vmatprep.subr.bf16.mxu1 %v5017_v8  ;;  %v5058_v8 = vld [vmem:[%s6306_s3 + $0x8a0] sm:$0xff]  }
 0x1ee   : > { %4624 = vmatpush3.bf16.msra.mxu0 %v5016_v9  ;;  %v5061_v9 = vld [vmem:[%s6306_s3 + $0x8e8] sm:$0xff]  }
 0x1ef   : > { %4625 = vmatprep.subr.bf16.mxu0 %v5019_v10  ;;  %v5060_v10 = vld [vmem:[%s6306_s3 + $0x828] sm:$0xff]  }
 0x1f0   : > { %4646 = vmatpush3.bf16.msra.mxu1 %v5018_v11  ;;  %v5063_v11 = vld [vmem:[%s6306_s3 + $0x870] sm:$0xff]  }
 0x1f1   : > { %4647 = vmatprep.subr.bf16.mxu1 %v5021_v12 }
 0x1f2   : > { %4626 = vmatpush3.bf16.msra.mxu0 %v5020_v13  ;;  %v5062_v13 = vld [vmem:[%s6306_s3 + $0x8a8] sm:$0xff]  }
 0x1f3   : > { %4627 = vmatprep.subr.bf16.mxu0 %v5023_v14 }
 0x1f4   : > { %4648 = vmatpush3.bf16.msra.mxu1 %v5022_v15  ;;  %v5065_v15 = vld [vmem:[%s6306_s3 + $0x8f0] sm:$0xff]  }
 0x1f5   : > { %4649 = vmatprep.subr.bf16.mxu1 %v5025_v16 }
 0x1f6   : > { %4628 = vmatpush3.bf16.msra.mxu0 %v5024_v17 }
 0x1f7   : > { %4629 = vmatprep.subr.bf16.mxu0 %v5027_v18 }
 0x1f8   : > { %4650 = vmatpush3.bf16.msra.mxu1 %v5026_v19  ;;  %v4327_v27 = vpop.f32.mrb[8].mxu0  ;;  %v5064_v19 = vld [vmem:[%s6306_s3 + $0x830] sm:$0xff]  }
 0x1f9   : > { %v4328_v31 = vpop.f32.mrb[9].mxu0  ;;  %4651 = vmatprep.subr.bf16.mxu1 %v5029_v20 }
 0x1fa   : > { %v4329_v33 = vadd.f32 %v4328_v31, %v4327_v27  ;;  %4630 = vmatpush3.bf16.msra.mxu0 %v5028_v21  ;;  %v4330_v36 = vpop.f32.mrb[10].mxu0  ;;  %v4349_v23 = vpop.f32.mrb[24].mxu1  ;;  %v5066_v31 = vld [vmem:[%s6306_s3 + $0x8b0] sm:$0xff]  }
 0x1fb   : > { %v4331_v38 = vpop.f32.mrb[11].mxu0  ;;  %v4350_v24 = vpop.f32.mrb[25].mxu1  ;;  %4631 = vmatprep.subr.bf16.mxu0 %v5031_v22  ;;  %v5067_v22 = vld [vmem:[%s6306_s3 + $0x878] sm:$0xff]  }
 0x1fc   : > { %v3117_v26 = vadd.f32 %v4329_v33, %v1353_v30  ;;  %v4351_v40 = vadd.f32 %v4350_v24, %v4349_v23  ;;  %4652 = vmatpush3.bf16.msra.mxu1 %v5030_v29  ;;  %v4352_v28 = vpop.f32.mrb[26].mxu1  ;;  %v5069_v33 = vld [vmem:[%s6306_s3 + $0x8f8] sm:$0xff]   ;;  %v737_v38 = vrot.slane %v5437_v4, 1  ;;  %v773_v24 = vpack.c.bf16 %v5437_v4, %v5437_v4 }
 0x1fd   : > { %v4353_v43 = vpop.f32.mrb[27].mxu1  ;;  %4653 = vmatprep.subr.bf16.mxu1 %v5033_v25  ;;  %v5068_v23 = vld [vmem:[%s6306_s3 + $0x838] sm:$0xff]  }
 0x1fe   : > { %v6116_v32 = vadd.f32 %v4351_v40, %v3117_v26  ;;  %4632 = vmatpush3.bf16.msra.mxu0 %v5032_v37  ;;  %v5070_v37 = vld [vmem:[%s6306_s3 + $0x8b8] sm:$0xff]  }
 0x1ff   : > { %4633 = vmatprep.subr.bf16.mxu0 %v5035_v39  ;;  %v775_v39 = vpack.c.bf16 %v737_v38, %v737_v38 }
 0x200   : > { %4654 = vmatpush3.bf16.msra.mxu1 %v5034_v42 }
 0x201   : > { %4655 = vmatprep.subr.bf16.mxu1 %v5037_v44 }
 0x202   : > { %4634 = vmatpush3.bf16.msra.mxu0 %v5036_v34 }
 0x203   : > { %4663 = vmatprep.subr.bf16.mxu0 %v5039_v48 }
 0x204   : > { %4656 = vmatpush3.bf16.msra.mxu1 %v5038_v49 }
 0x205   : > { %3675 = vmatmul.mubr.bf16.vlgmr.msra.gmra.mrb[36].mxu0 %v769_v54  ;;  %4685 = vmatprep.subr.bf16.mxu1 %v5041_v51 }
 0x206   : > { %4664 = vmatpush3.bf16.msra.mxu0 %v5040_v52  ;;  %3754 = vmatprep.mubr.bf16.mxu0 %v774_v45 }
 0x207   : > { %3715 = vmatmul.mubr.bf16.vlgmr.msra.gmra.mrb[52].mxu1 %v771_v57  ;;  %4665 = vmatprep.subr.bf16.mxu0 %v5043_v55 }
 0x208   : > { %4686 = vmatpush3.bf16.msra.mxu1 %v5042_v56  ;;  %3794 = vmatprep.mubr.bf16.mxu1 %v776_v47 }
 0x209   : > { %4687 = vmatprep.subr.bf16.mxu1 %v5045_v58 }
 0x20a   : > { %4666 = vmatpush3.bf16.msra.mxu0 %v5044_v59 }
 0x20b   : > { %4667 = vmatprep.subr.bf16.mxu0 %v5047_v7  ;;  %v5071_v7 = vld [vmem:[%s6308_s5] sm:$0xff]  }
 0x20c   : > { %4688 = vmatpush3.bf16.msra.mxu1 %v5046_v60  ;;  %v5145_v60 = vmov 0.0  }
 0x20d   : > { %4689 = vmatprep.subr.bf16.mxu1 %v5049_v61  ;;  %v5072_v61 = vld [vmem:[%s6308_s5 + $0x8] sm:$0xff]  }
 0x20e   : > { %4668 = vmatpush3.bf16.msra.mxu0 %v5048_v62  ;;  %v5073_v62 = vld [vmem:[%s6308_s5 + $0x10] sm:$0xff]  }
 0x20f   : > { %4669 = vmatprep.subr.bf16.mxu0 %v5051_v63  ;;  %v5074_v63 = vld [vmem:[%s6308_s5 + $0x18] sm:$0xff]  }
 0x210   : > { %4690 = vmatpush3.bf16.msra.mxu1 %v5050_v0  ;;  %v5075_v0 = vld [vmem:[%s6308_s5 + $0x20] sm:$0xff]  }
 0x211   : > { %4691 = vmatprep.subr.bf16.mxu1 %v5053_v41 }
 0x212   : > { %4670 = vmatpush3.bf16.msra.mxu0 %v5052_v1 }
 0x213   : > { %4671 = vmatprep.subr.bf16.mxu0 %v5055_v2 }
 0x214   : > { %4692 = vmatpush3.bf16.msra.mxu1 %v5054_v35 }
 0x215   : > { %4693 = vmatprep.subr.bf16.mxu1 %v5057_v3 }
 0x216   : > { %4672 = vmatpush3.bf16.msra.mxu0 %v5056_v5 }
 0x217   : > { %4673 = vmatprep.subr.bf16.mxu0 %v5059_v6 }
 0x218   : > { %v4371_v12 = vpop.f32.mrb[12].mxu0  ;;  %4694 = vmatpush3.bf16.msra.mxu1 %v5058_v8 }
 0x219   : > { %v4372_v14 = vpop.f32.mrb[13].mxu0  ;;  %4695 = vmatprep.subr.bf16.mxu1 %v5061_v9 }
 0x21a   : > { %v4373_v16 = vadd.f32 %v4372_v14, %v4371_v12  ;;  %v4374_v17 = vpop.f32.mrb[14].mxu0  ;;  %v4393_v18 = vpop.f32.mrb[28].mxu1  ;;  %4674 = vmatpush3.bf16.msra.mxu0 %v5060_v10  ;;  %v5077_v14 = vld [vmem:[%s6308_s5 + $0x30] sm:$0xff]  }
 0x21b   : > { %v4375_v20 = vpop.f32.mrb[15].mxu0  ;;  %v4394_v21 = vpop.f32.mrb[29].mxu1  ;;  %4675 = vmatprep.subr.bf16.mxu0 %v5063_v11  ;;  %v5076_v11 = vld [vmem:[%s6308_s5 + $0x28] sm:$0xff]  }
 0x21c   : > { %v3197_v27 = vadd.f32 %v4373_v16, %v6116_v32  ;;  %v4395_v29 = vadd.f32 %v4394_v21, %v4393_v18  ;;  %v4396_v30 = vpop.f32.mrb[30].mxu1  ;;  %4696 = vmatpush3.bf16.msra.mxu1 %v5062_v13 }
 0x21d   : > { %v4397_v25 = vpop.f32.mrb[31].mxu1  ;;  %4697 = vmatprep.subr.bf16.mxu1 %v5065_v15  ;;  %v5078_v15 = vld [vmem:[%s6308_s5 + $0x38] sm:$0xff]  }
 0x21e   : > { %v3237_v36 = vadd.f32 %v4395_v29, %v3197_v27  ;;  %4676 = vmatpush3.bf16.msra.mxu0 %v5064_v19 }
 0x21f   : > { %4677 = vmatprep.subr.bf16.mxu0 %v5067_v22 }
 0x220   : > { %4698 = vmatpush3.bf16.msra.mxu1 %v5066_v31 }
 0x221   : > { %4699 = vmatprep.subr.bf16.mxu1 %v5069_v33 }
 0x222   : > { %4678 = vmatpush3.bf16.msra.mxu0 %v5068_v23 }
 0x223   : > { %4716 = vmatprep.subr.bf16.mxu0 %v5145_v60 }
 0x224   : > { %4700 = vmatpush3.bf16.msra.mxu1 %v5070_v37 }
 0x225   : > { %3755 = vmatmul.mubr.bf16.vlgmr.msra.gmra.mrb[40].mxu0 %v773_v24 }
 0x226   : > { %4717 = vmatpush3.bf16.msra.mxu0 %v5071_v7  ;;  %4732 = vmatprep.mubr.msk.bf16.mxu0 %vm5146_vm3, %v5145_v60 }
 0x227   : > { %3795 = vmatmul.mubr.bf16.vlgmr.msra.gmra.mrb[56].mxu1 %v775_v39  ;;  %4718 = vmatprep.subr.bf16.mxu0 %v5145_v60 }
 0x22a   : > { %4719 = vmatpush3.bf16.msra.mxu0 %v5072_v61 }
 0x22b   : > { %4720 = vmatprep.subr.bf16.mxu0 %v5145_v60 }
 0x22e   : > { %4721 = vmatpush3.bf16.msra.mxu0 %v5073_v62 }
 0x22f   : > { %4722 = vmatprep.subr.bf16.mxu0 %v5145_v60 }
 0x232   : > { %4723 = vmatpush3.bf16.msra.mxu0 %v5074_v63 }
 0x233   : > { %4724 = vmatprep.subr.bf16.mxu0 %v5145_v60 }
 0x236   : > { %4725 = vmatpush3.bf16.msra.mxu0 %v5075_v0 }
 0x237   : > { %4726 = vmatprep.subr.bf16.mxu0 %v5145_v60 }
 0x238   : > { %v4415_v26 = vpop.f32.mrb[16].mxu0 }
 0x239   : > { %v4416_v40 = vpop.f32.mrb[17].mxu0 }
 0x23a   : > { %v4417_v28 = vadd.f32 %v4416_v40, %v4415_v26  ;;  %v4418_v42 = vpop.f32.mrb[18].mxu0  ;;  %v4437_v43 = vpop.f32.mrb[32].mxu1  ;;  %4727 = vmatpush3.bf16.msra.mxu0 %v5076_v11 }
 0x23b   : > { %v4419_v44 = vpop.f32.mrb[19].mxu0  ;;  %v4438_v32 = vpop.f32.mrb[33].mxu1  ;;  %4728 = vmatprep.subr.bf16.mxu0 %v5145_v60 }
 0x23c   : > { %v3277_v34 = vadd.f32 %v4417_v28, %v3237_v36  ;;  %v4439_v46 = vadd.f32 %v4438_v32, %v4437_v43  ;;  %v4440_v48 = vpop.f32.mrb[34].mxu1 }
 0x23d   : > { %v4441_v49 = vpop.f32.mrb[35].mxu1 }
 0x23e   : > { %v3317_v50 = vadd.f32 %v4439_v46, %v3277_v34  ;;  %4729 = vmatpush3.bf16.msra.mxu0 %v5077_v14 }
 0x23f   : > { %4730 = vmatprep.subr.bf16.mxu0 %v5145_v60 }
 0x242   : > { %4731 = vmatpush3.bf16.msra.mxu0 %v5078_v15 }
 0x258   : > { %v4459_v51 = vpop.f32.mrb[20].mxu0 }
 0x259   : > { %v4460_v52 = vpop.f32.mrb[21].mxu0 }
 0x25a   : > { %v4461_v53 = vadd.f32 %v4460_v52, %v4459_v51  ;;  %v4462_v4 = vpop.f32.mrb[22].mxu0  ;;  %v4481_v54 = vpop.f32.mrb[36].mxu1 }
 0x25b   : > { %v4463_v55 = vpop.f32.mrb[23].mxu0  ;;  %v4482_v45 = vpop.f32.mrb[37].mxu1 }
 0x25c   : > { %v3357_v56 = vadd.f32 %v4461_v53, %v3317_v50  ;;  %v4483_v57 = vadd.f32 %v4482_v45, %v4481_v54  ;;  %v4484_v58 = vpop.f32.mrb[38].mxu1 }
 0x25d   : > { %v4485_v47 = vpop.f32.mrb[39].mxu1 }
 0x25e   : > { %v3397_v59 = vadd.f32 %v4483_v57, %v3357_v56 }
 0x278   : > { %v4503_v41 = vpop.f32.mrb[24].mxu0 }
 0x279   : > { %v4504_v1 = vpop.f32.mrb[25].mxu0 }
 0x27a   : > { %v4505_v2 = vadd.f32 %v4504_v1, %v4503_v41  ;;  %v4506_v35 = vpop.f32.mrb[26].mxu0  ;;  %v4525_v3 = vpop.f32.mrb[40].mxu1  ;;  %v3820_v1 = vld [vmem:[%s6309_s6] sm:$0x1] }
 0x27b   : > { %v4507_v5 = vpop.f32.mrb[27].mxu0  ;;  %v4526_v6 = vpop.f32.mrb[41].mxu1 }
 0x27c   : > { %v3437_v8 = vadd.f32 %v4505_v2, %v3397_v59  ;;  %v4527_v9 = vadd.f32 %v4526_v6, %v4525_v3  ;;  %v4528_v10 = vpop.f32.mrb[42].mxu1 }
 0x27d   : > { %v4529_v12 = vpop.f32.mrb[43].mxu1 }
 0x27e   : > { %v3477_v13 = vadd.f32 %v4527_v9, %v3437_v8 }
 0x298   : > { %v4547_v16 = vpop.f32.mrb[28].mxu0 }
 0x299   : > { %v4548_v17 = vpop.f32.mrb[29].mxu0 }
 0x29a   : > { %v4549_v18 = vadd.f32 %v4548_v17, %v4547_v16  ;;  %v4550_v19 = vpop.f32.mrb[30].mxu0  ;;  %v4569_v20 = vpop.f32.mrb[44].mxu1 }
 0x29b   : > { %v4551_v21 = vpop.f32.mrb[31].mxu0  ;;  %v4570_v22 = vpop.f32.mrb[45].mxu1 }
 0x29c   : > { %v3517_v27 = vadd.f32 %v4549_v18, %v3477_v13  ;;  %v4571_v29 = vadd.f32 %v4570_v22, %v4569_v20  ;;  %v4572_v30 = vpop.f32.mrb[46].mxu1 }
 0x29d   : > { %v4573_v31 = vpop.f32.mrb[47].mxu1 }
 0x29e   : > { %v3557_v25 = vadd.f32 %v4571_v29, %v3517_v27 }
 0x2b8   : > { %v4591_v33 = vpop.f32.mrb[32].mxu0 }
 0x2b9   : > { %v4592_v36 = vpop.f32.mrb[33].mxu0 }
 0x2ba   : > { %v4593_v23 = vadd.f32 %v4592_v36, %v4591_v33  ;;  %v4594_v37 = vpop.f32.mrb[34].mxu0  ;;  %v4613_v38 = vpop.f32.mrb[48].mxu1 }
 0x2bb   : > { %v4595_v24 = vpop.f32.mrb[35].mxu0  ;;  %v4614_v39 = vpop.f32.mrb[49].mxu1 }
 0x2bc   : > { %v3597_v26 = vadd.f32 %v4593_v23, %v3557_v25  ;;  %v4615_v40 = vadd.f32 %v4614_v39, %v4613_v38  ;;  %v4616_v28 = vpop.f32.mrb[50].mxu1 }
 0x2bd   : > { %v4617_v42 = vpop.f32.mrb[51].mxu1 }
 0x2be   : > { %v3637_v43 = vadd.f32 %v4615_v40, %v3597_v26 }
 0x2d8   : > { %v4635_v44 = vpop.f32.mrb[36].mxu0 }
 0x2d9   : > { %v4636_v32 = vpop.f32.mrb[37].mxu0 }
 0x2da   : > { %v4637_v34 = vadd.f32 %v4636_v32, %v4635_v44  ;;  %v4638_v46 = vpop.f32.mrb[38].mxu0  ;;  %v4657_v48 = vpop.f32.mrb[52].mxu1 }
 0x2db   : > { %v4639_v49 = vpop.f32.mrb[39].mxu0  ;;  %v4658_v50 = vpop.f32.mrb[53].mxu1 }
 0x2dc   : > { %v3677_v51 = vadd.f32 %v4637_v34, %v3637_v43  ;;  %v4659_v52 = vadd.f32 %v4658_v50, %v4657_v48  ;;  %v4660_v53 = vpop.f32.mrb[54].mxu1 }
 0x2dd   : > { %v4661_v4 = vpop.f32.mrb[55].mxu1 }
 0x2de   : > { %v3717_v54 = vadd.f32 %v4659_v52, %v3677_v51 }
 0x2f8   : > { %v4679_v55 = vpop.f32.mrb[40].mxu0 }
 0x2f9   : > { %v4680_v45 = vpop.f32.mrb[41].mxu0 }
 0x2fa   : > { %v4681_v56 = vadd.f32 %v4680_v45, %v4679_v55  ;;  %v4682_v57 = vpop.f32.mrb[42].mxu0  ;;  %v4701_v58 = vpop.f32.mrb[56].mxu1 }
 0x2fb   : > { %v4683_v47 = vpop.f32.mrb[43].mxu0  ;;  %v4702_v59 = vpop.f32.mrb[57].mxu1 }
 0x2fc   : > { %v3757_v7 = vadd.f32 %v4681_v56, %v3717_v54  ;;  %v4703_v60 = vadd.f32 %v4702_v59, %v4701_v58  ;;  %v4704_v61 = vpop.f32.mrb[58].mxu1 }
 0x2fd   : > { %v4705_v62 = vpop.f32.mrb[59].mxu1 }
 0x2fe   : > { %v3797_v63 = vadd.f32 %v4703_v60, %v3757_v7 }
 0x300   : > { %v3802_v0 = vmax.f32 %v3797_v63, 0.0 }
 0x302   : > { %v3803_v41 = vpack.c.bf16 %v3802_v0, %v3802_v0 }
 0x304   : > { %4733 = vmatmul.mubr.bf16.vlgmr.msra.gmra.mrb[44].mxu0 %v3803_v41 }
 0x3d7   : > { %v3903_v2 = vpop.f32.mrb[44].mxu0 }
 0x3d8   : > { %v3904_v35 = vadd.f32 %v3903_v2, %v3820_v1  ;;  %v4734_v3 = vpop.f32.mrb[45].mxu0 }
 0x3d9   : > { %v3906_v5 = vpop.f32.mrb[46].mxu0 }
 0x3da   : > { %v4735_v6 = vpop.f32.mrb[47].mxu0  ;;  %3910 = vst.msk [vmem:[%s270_s29] sm:$0x1] %vm3909_vm4, %v3904_v35 }
 0x3db   : > { %5092 = shalt.err (!%p5089_p3)
}
 0x3dc   : > { %s5093_s19 = scalar_lea.hbm %s6261_s14, 16  ;;  %s5097_s22 = scalar_lea.hbm %s6310_s7, 32 }
 0x3dd   : > { %p5094_p4 = scmp.ne.s32.totalorder %s6261_s14, %s5093_s19  ;;  %p5098_p9 = scmp.lt.u32.totalorder %s6261_s14, %s6310_s7 }
 0x3de   : > { %p5099_p10 = scmp.lt.u32.totalorder %s5097_s22, %s5093_s19  ;;  %p5101_p12 = scmp.lt.u32.totalorder %s5093_s19, %s6261_s14 }
 0x3df   : > { %p5095_p7 = pnand %p5094_p4, %p5226_p5 }
 0x3e0   : > { %p5100_p11 = por %p5099_p10, %p5098_p9 }
 0x3e1   : > { %p5096_p8 = pneg %p5095_p7 }
 0x3e2   : > { %p5102_p13 = por %p5101_p12, %p5100_p11 }
 0x3e4   : > { %p5103_p0 = pnand %p5102_p13, %p5096_p8 }
 0x3e6   : > { %5106 = shalt.err (!%p5103_p0)
}
 0x3e7   : > { %4736 = dma.vmem_to_hbm [thread:$0]  (%p5226_p5), %s6263_s8, 16, %s6261_s14, %s3912_s28  }
 0x3e8 PF: > { %p4742_p1 = scmp.ge.s32.totalorder %s5141_s27, 2  ;;  %s3936_s9 = sand.u32 1, %s5129_s24  }
 0x3e9   : > { %s3937_s13 = scalar_lea.sflag [#allocation3], %s3936_s9 }
 0x3ea   : > { %p4739_p2 = pnand %p4742_p1, %p5230_p6 }
 0x3ec   : > { %5124 = dma.done.wait (!%p4739_p2), %s3937_s13, 16  }
 0x3ed   : > { %5126 = vsyncadd (!%p4739_p2), %s3937_s13, 4294967280  ;;  %p17_p3 = scmp.ge.s32.totalorder %s5213_s30, 4   ;;  %s6313_s24 = smov %s5133_s25 }
 0x3ee   : > { %s6314_s25 = smov %s5137_s26  ;;  %s6315_s26 = smov %s5224_s10 }
 0x3ef   : > { %s6316_s27 = smov %s5213_s30  ;;  %19 = sbr.rel (!%p17_p3) target bundleno = 3 (0x3), region = 83 }
 0x3f6   :  { %3941 = vsyncpa [#allocation3], 1 }
 0x3f7   :  { %3943 = vsyncpa [#allocation3 + $0x1], 1 }

</bundles_post_ra>
